<compile_context>
chip_gen: v6e
topology: v6e:2x2x1
jax: 0.10.0
libtpu: 0.0.40
codegen_flags: <defaults>
</compile_context>

<pallas_src>
import functools

import jax
import jax.numpy as jnp
from jax.experimental import pallas as pl
from jax.experimental.pallas import tpu as pltpu


# ----------------------------------------------------------------------------
# Fused Pallas kernel: entire GraphAttention forward in one grid step.
# All tensors are in the transposed ("big axis on lanes") layout.
# ----------------------------------------------------------------------------
def _graph_attention_kernel(feats_ref, rels_ref, relemb_ref, src_ref, dst_ref,
                            attn_ref, proxy_ref, proxyt_ref, gatet_ref,
                            bias_ref, o_ref, outs_ref, *, depth):
    dim, n = feats_ref.shape              # (node_hidden, node_size) = (32, 128)
    t = src_ref.shape[1]                  # triple_size = 256
    eps2 = jnp.float32(1e-24)             # F.normalize eps (1e-12) on squared norm
    tiny = jnp.float32(1e-30)

    # features = activation(features); store block 0 of the concat accumulator.
    feats = jnp.tanh(feats_ref[...])                                    # (dim, N)
    outs_ref[0:dim, :] = feats

    # rels_sum = F.normalize(sparse_rel @ rel_emb), layer-invariant -> hoisted.
    # Transposed: (dim, col) @ (col, T) -> (dim, T); normalize over dim (sublanes).
    rels_sum = jnp.dot(relemb_ref[...], rels_ref[...],
                       preferred_element_type=jnp.float32)              # (dim, T)
    rels_sum = rels_sum * jax.lax.rsqrt(
        jnp.maximum(jnp.sum(rels_sum * rels_sum, axis=0, keepdims=True), eps2))

    # One-hots built in-kernel from the int32 edge endpoints (no 128 KiB DMAs).
    # src_oh[n, t] = (src[t] == n)   -> gather operand  (N, T)
    # dst_oh[t, n] = (dst[t] == n)   -> scatter operand (T, N)
    src_oh = (jax.lax.broadcasted_iota(jnp.int32, (n, t), 0)
              == src_ref[...]).astype(jnp.float32)                      # (N, T)
    dst_oh = (jax.lax.broadcasted_iota(jnp.int32, (t, n), 1)
              == dst_ref[...]).astype(jnp.float32)                      # (T, N)

    # Layer-invariant attention logits / exp / per-dst-node softmax denominators,
    # hoisted out of the depth loop. Shifting by the per-layer global max is
    # mathematically identical to the per-segment max and cheaper.
    att_all = jnp.dot(attn_ref[...], rels_sum,
                      preferred_element_type=jnp.float32)               # (depth, T)
    p_all = jnp.exp(att_all - jnp.max(att_all, axis=-1, keepdims=True)) # (depth, T)
    denom_all = jnp.dot(p_all, dst_oh,
                        preferred_element_type=jnp.float32)             # (depth, N)
    inv_denom_all = pl.reciprocal(jnp.maximum(denom_all, tiny), approx=True)

    for l in range(depth):
        # neighs = features[src] as a one-hot matmul; feats never leaves VMEM.
        neighs = jnp.dot(feats, src_oh,
                         preferred_element_type=jnp.float32)            # (dim, T)
        # Householder reflection about rels_sum.
        hdot = jnp.sum(neighs * rels_sum, axis=0, keepdims=True)        # (1, T)
        neighs = neighs - 2.0 * hdot * rels_sum
        # Softmax-weighted scatter_add over dst nodes, without materializing
        # alpha: weight edges by exp-logit, scatter via one-hot matmul, then
        # normalize by the per-node denominator.
        neighs = neighs * p_all[l:l + 1, :]                             # (dim, T)
        scat = jnp.dot(neighs, dst_oh,
                       preferred_element_type=jnp.float32)              # (dim, N)
        feats = jnp.tanh(scat * inv_denom_all[l:l + 1, :])              # (dim, N)
        # Stream into the concat accumulator at an aligned sublane offset.
        outs_ref[(l + 1) * dim:(l + 2) * dim, :] = feats

    outputs = outs_ref[...]                                             # (d3, N)

    # Proxy attention + gate.
    xn = outputs * jax.lax.rsqrt(
        jnp.maximum(jnp.sum(outputs * outputs, axis=0, keepdims=True), eps2))
    proxy = proxy_ref[...]                                              # (P, d3)
    pn = proxy * jax.lax.rsqrt(
        jnp.maximum(jnp.sum(proxy * proxy, axis=-1, keepdims=True), eps2))
    logits = jnp.dot(pn, xn, preferred_element_type=jnp.float32)        # (P, N)
    pe = jnp.exp(logits - jnp.max(logits, axis=0, keepdims=True))
    patt = pe * pl.reciprocal(jnp.sum(pe, axis=0, keepdims=True), approx=True)
    # pf = outputs - patt @ proxy   (transposed: proxy^T @ patt^T)
    pf = outputs - jnp.dot(proxyt_ref[...], patt,
                           preferred_element_type=jnp.float32)          # (d3, N)
    gate = jax.nn.sigmoid(
        jnp.dot(gatet_ref[...], pf, preferred_element_type=jnp.float32)
        + bias_ref[...])                                                # (d3, N)
    o_ref[...] = gate * outputs + (1.0 - gate) * pf


def graph_attention_pallas(feats_t, rels_dense_t, rel_emb_t, src_row, dst_col,
                           attn_all, proxy, proxy_t, gate_t, bias_col, *, depth):
    dim, n = feats_t.shape
    d3 = dim * (depth + 1)

    def full(shape):
        return pl.BlockSpec(shape, lambda i: (0,) * len(shape))

    return pl.pallas_call(
        functools.partial(_graph_attention_kernel, depth=depth),
        out_shape=jax.ShapeDtypeStruct((d3, n), jnp.float32),
        # Entire working set is < 1 MiB: a single grid step avoids per-step
        # pipeline overhead and re-fetch of invariant operands on v5e/v6e/v7x.
        # TODO(synk): when node/triple counts grow, add a leading "parallel"
        # grid axis tiled over dst-node blocks (v7x megacore) and move the
        # gather/scatter to index-driven DMA instead of dense one-hots.
        grid=(1,),
        in_specs=[full(feats_t.shape), full(rels_dense_t.shape),
                  full(rel_emb_t.shape), full(src_row.shape),
                  full(dst_col.shape), full(attn_all.shape),
                  full(proxy.shape), full(proxy_t.shape),
                  full(gate_t.shape), full(bias_col.shape)],
        out_specs=full((d3, n)),
        scratch_shapes=[pltpu.VMEM((d3, n), jnp.float32)],
        compiler_params=pltpu.CompilerParams(
            dimension_semantics=("arbitrary",)),
    )(feats_t, rels_dense_t, rel_emb_t, src_row, dst_col, attn_all,
      proxy, proxy_t, gate_t, bias_col)


# ----------------------------------------------------------------------------
# GraphAttention forward (thin JAX glue + one fused Pallas kernel)
# ----------------------------------------------------------------------------
@functools.partial(jax.jit, static_argnames=("depth", "node_size"))
def graph_attention_forward(params, features, rel_emb, adj_index,
                            sparse_indices, sparse_val, *, depth, node_size):
    T = adj_index.shape[0]
    col = rel_emb.shape[0]
    dim = features.shape[1]
    d3 = dim * (depth + 1)

    # Densify the transposed (col, triple_size) sparse relation matrix
    # (duplicates summed, matching un-coalesced torch.sparse matmul semantics).
    rels_dense_t = jnp.zeros((col, T), jnp.float32).at[
        sparse_indices[:, 1], sparse_indices[:, 0]].add(sparse_val)

    # TODO(synk): assumes adj_index is unique & row-sorted so torch's coalesce()
    # value ordering matches the original triple order.
    dst_col = adj_index[:, 0].astype(jnp.int32).reshape(T, 1)
    src_row = adj_index[:, 1].astype(jnp.int32).reshape(1, T)

    # Stack the (dim, 1) attention kernels as (depth, dim) rows.
    attn_all = jnp.concatenate([a.reshape(1, -1) for a in params["attn"]],
                               axis=0)

    out_t = graph_attention_pallas(
        features.T, rels_dense_t, rel_emb.T, src_row, dst_col, attn_all,
        params["proxy"], params["proxy"].T, params["gate_kernel"].T,
        params["bias"].reshape(d3, 1), depth=depth)
    return out_t.T                                                      # (N, d3)


# ----------------------------------------------------------------------------
# Pure-JAX reference (mirrors the torch module) for a tolerance check.
# ----------------------------------------------------------------------------
def reference_forward(params, features, rel_emb, adj_index, sparse_indices,
                      sparse_val, *, depth, node_size):
    T = adj_index.shape[0]
    col = rel_emb.shape[0]
    rels_dense = jnp.zeros((T, col), jnp.float32).at[
        sparse_indices[:, 0], sparse_indices[:, 1]].add(sparse_val)
    row = adj_index[:, 0]
    src = adj_index[:, 1]
    feats = jnp.tanh(features)
    outs = [feats]
    for l in range(depth):
        attn_k = params["attn"][l]
        rels_sum = rels_dense @ rel_emb
        rels_sum = rels_sum / jnp.maximum(
            jnp.linalg.norm(rels_sum, axis=-1, keepdims=True), 1e-12)
        neighs = feats[src]
        neighs = neighs - 2.0 * jnp.sum(neighs * rels_sum, -1,
                                        keepdims=True) * rels_sum
        att1 = (rels_sum @ attn_k)[:, 0]
        m = jax.ops.segment_max(att1, row, num_segments=node_size)
        e = jnp.exp(att1 - m[row])
        denom = jax.ops.segment_sum(e, row, num_segments=node_size)
        att = e / denom[row]
        feats = jnp.tanh(jax.ops.segment_sum(neighs * att[:, None], row,
                                             num_segments=node_size))
        outs.append(feats)
    outputs = jnp.concatenate(outs, axis=1)
    xn = outputs / jnp.maximum(
        jnp.linalg.norm(outputs, axis=-1, keepdims=True), 1e-12)
    proxy = params["proxy"]
    pn = proxy / jnp.maximum(
        jnp.linalg.norm(proxy, axis=-1, keepdims=True), 1e-12)
    patt = jax.nn.softmax(xn @ pn.T, axis=-1)
    pf = outputs - patt @ proxy
    gate = jax.nn.sigmoid(pf @ params["gate_kernel"] + params["bias"])
    return gate * outputs + (1.0 - gate) * pf


# ----------------------------------------------------------------------------
# Deterministic parameter / input construction
# ----------------------------------------------------------------------------
def xavier_normal(key, shape):
    fan_in, fan_out = shape[-2], shape[-1]
    std = (2.0 / (fan_in + fan_out)) ** 0.5
    return std * jax.random.normal(key, shape, dtype=jnp.float32)


if __name__ == "__main__":
    node_size = 128     # number of entities
    rel_size = 32       # number of relations (col of the triple sparse matrix)
    triple_size = 256   # number of triples / edges
    dim = 32            # node_hidden
    depth = 2
    D3 = dim * (depth + 1)   # 96
    n_proxy = 64

    key = jax.random.PRNGKey(0)
    keys = jax.random.split(key, 8)

    params = {
        "attn": [xavier_normal(keys[d], (dim, 1)) for d in range(depth)],
        "gate_kernel": xavier_normal(keys[2], (D3, D3)),
        "proxy": xavier_normal(keys[3], (n_proxy, D3)),
        "bias": xavier_normal(keys[4], (1, D3)),
    }

    # Module inputs: [features, rel_emb, adj_index, sparse_indices, sparse_val]
    features = xavier_normal(keys[5], (node_size, dim))
    rel_emb = xavier_normal(keys[6], (rel_size, dim))

    # Two edges per node (unique).
    i = jnp.arange(node_size, dtype=jnp.int32)
    dst = jnp.repeat(i, 2)
    src = jnp.stack([(i + 1) % node_size, (i + 3) % node_size],
                    axis=1).reshape(-1)
    adj_index = jnp.stack([dst, src], axis=1)                   # (256, 2)

    t = jnp.arange(triple_size, dtype=jnp.int32)
    sparse_indices = jnp.stack([t, t % rel_size], axis=1)       # (256, 2)
    sparse_val = jnp.ones((triple_size,), jnp.float32)

    out = graph_attention_forward(params, features, rel_emb, adj_index,
                                  sparse_indices, sparse_val,
                                  depth=depth, node_size=node_size)
    out = jax.block_until_ready(out)
    assert out.shape == (node_size, D3), out.shape
    assert bool(jnp.all(jnp.isfinite(out)))

    ref = reference_forward(params, features, rel_emb, adj_index,
                            sparse_indices, sparse_val,
                            depth=depth, node_size=node_size)
    max_err = float(jnp.max(jnp.abs(out - ref)))
    # Generous tolerance: pl.reciprocal(approx=True) in the softmax denominators
    # introduces ~1e-3-level relative error by design.
    assert max_err < 3e-2, f"max abs error vs reference = {max_err}"
    print("KERNEL_OK")
</pallas_src>

<mosaic_0001>
module attributes {stable_mosaic.version = 11 : i64} {
  func.func private @main(%arg0: i32) attributes {dimension_semantics = [#tpu.dimension_semantics<core_parallel>], iteration_bounds = array<i64: 2>, tpu.core_type = #tpu.core_type<sc_scalar_subcore>, window_params = []} {
    return
  }
}

module attributes {stable_mosaic.version = 11 : i64} {
  func.func private @main(%arg0: i32) attributes {dimension_semantics = [#tpu.dimension_semantics<core_parallel>], iteration_bounds = array<i64: 2>, tpu.core_type = #tpu.core_type<sc_scalar_subcore>, window_params = []} {
    return
  }
}

module attributes {stable_mosaic.version = 11 : i64} {
  func.func @_graph_attention_kernel(%arg0: i32, %arg1: memref<32x128xf32, #tpu.memory_space<vmem>>, %arg2: memref<32x256xf32, #tpu.memory_space<vmem>>, %arg3: memref<32x32xf32, #tpu.memory_space<vmem>>, %arg4: memref<1x256xi32, #tpu.memory_space<vmem>>, %arg5: memref<256x1xi32, #tpu.memory_space<vmem>>, %arg6: memref<2x32xf32, #tpu.memory_space<vmem>>, %arg7: memref<64x96xf32, #tpu.memory_space<vmem>>, %arg8: memref<96x64xf32, #tpu.memory_space<vmem>>, %arg9: memref<96x96xf32, #tpu.memory_space<vmem>>, %arg10: memref<96x1xf32, #tpu.memory_space<vmem>>, %arg11: memref<96x128xf32, #tpu.memory_space<vmem>>, %arg12: memref<96x128xf32, #tpu.memory_space<vmem>>) attributes {dimension_semantics = [#tpu.dimension_semantics<arbitrary>], iteration_bounds = array<i64: 1>, scalar_prefetch = 0 : i64, scratch_operands = 1 : i64, tpu.core_type = #tpu.core_type<tc>, window_params = [{pipeline_mode = #tpu.pipeline_mode<synchronous>, transform_indices = @transform_0, window_bounds = array<i64: 32, 128>}, {pipeline_mode = #tpu.pipeline_mode<synchronous>, transform_indices = @transform_1, window_bounds = array<i64: 32, 256>}, {pipeline_mode = #tpu.pipeline_mode<synchronous>, transform_indices = @transform_2, window_bounds = array<i64: 32, 32>}, {pipeline_mode = #tpu.pipeline_mode<synchronous>, transform_indices = @transform_3, window_bounds = array<i64: 1, 256>}, {pipeline_mode = #tpu.pipeline_mode<synchronous>, transform_indices = @transform_4, window_bounds = array<i64: 256, 1>}, {pipeline_mode = #tpu.pipeline_mode<synchronous>, transform_indices = @transform_5, window_bounds = array<i64: 2, 32>}, {pipeline_mode = #tpu.pipeline_mode<synchronous>, transform_indices = @transform_6, window_bounds = array<i64: 64, 96>}, {pipeline_mode = #tpu.pipeline_mode<synchronous>, transform_indices = @transform_7, window_bounds = array<i64: 96, 64>}, {pipeline_mode = #tpu.pipeline_mode<synchronous>, transform_indices = @transform_8, window_bounds = array<i64: 96, 96>}, {pipeline_mode = #tpu.pipeline_mode<synchronous>, transform_indices = @transform_9, window_bounds = array<i64: 96, 1>}, {pipeline_mode = #tpu.pipeline_mode<synchronous>, transform_indices = @transform_10, window_bounds = array<i64: 96, 128>}]} {
    %c0 = arith.constant 0 : index
    %c0_0 = arith.constant 0 : index
    %0 = vector.load %arg1[%c0, %c0_0] : memref<32x128xf32, #tpu.memory_space<vmem>>, vector<32x128xf32>
    %1 = math.tanh %0 : vector<32x128xf32>
    %c0_1 = arith.constant 0 : index
    %c0_2 = arith.constant 0 : index
    %2 = vector.load %arg12[%c0_1, %c0_2] : memref<96x128xf32, #tpu.memory_space<vmem>>, vector<32x128xf32>
    tpu.vector_store %arg12[%c0_1, %c0_2], %1 {strides = array<i32>} : memref<96x128xf32, #tpu.memory_space<vmem>>, vector<32x128xf32>,
    %c0_3 = arith.constant 0 : index
    %c0_4 = arith.constant 0 : index
    %3 = vector.load %arg3[%c0_3, %c0_4] : memref<32x32xf32, #tpu.memory_space<vmem>>, vector<32x32xf32>
    %c0_5 = arith.constant 0 : index
    %c0_6 = arith.constant 0 : index
    %4 = vector.load %arg2[%c0_5, %c0_6] : memref<32x256xf32, #tpu.memory_space<vmem>>, vector<32x256xf32>
    %cst = arith.constant dense<0.000000e+00> : vector<32x256xf32>
    %5 = tpu.matmul %3, %4, %cst {dimension_numbers = #tpu.dot_dimension_numbers<[1], [0], [0], [1], [0, 0, 1, 1], [], []>} : vector<32x32xf32>, vector<32x256xf32>, vector<32x256xf32> -> vector<32x256xf32>
    %6 = arith.mulf %5, %5 : vector<32x256xf32>
    %cst_7 = arith.constant dense<0.000000e+00> : vector<256xf32>
    %7 = vector.multi_reduction <add>, %6, %cst_7 [0] : vector<32x256xf32> to vector<256xf32>
    %8 = vector.shape_cast %7 : vector<256xf32> to vector<1x256xf32>
    %cst_8 = arith.constant 1.000000e-24 : f32
    %9 = vector.broadcast %cst_8 : f32 to vector<1x256xf32>
    %10 = arith.maximumf %8, %9 : vector<1x256xf32>
    %11 = math.rsqrt %10 : vector<1x256xf32>
    %12 = vector.broadcast %11 : vector<1x256xf32> to vector<32x256xf32>
    %13 = arith.mulf %5, %12 : vector<32x256xf32>
    %14 = tpu.iota {dimensions = array<i32: 0>} : vector<128x256xi32>
    %c0_9 = arith.constant 0 : index
    %c0_10 = arith.constant 0 : index
    %15 = vector.load %arg4[%c0_9, %c0_10] : memref<1x256xi32, #tpu.memory_space<vmem>>, vector<1x256xi32>
    %16 = vector.broadcast %15 : vector<1x256xi32> to vector<128x256xi32>
    %17 = arith.cmpi eq, %14, %16 : vector<128x256xi32>
    %18 = arith.extui %17 : vector<128x256xi1> to vector<128x256xi32>
    %19 = arith.sitofp %18 : vector<128x256xi32> to vector<128x256xf32>
    %20 = tpu.iota {dimensions = array<i32: 1>} : vector<256x128xi32>
    %c0_11 = arith.constant 0 : index
    %c0_12 = arith.constant 0 : index
    %21 = vector.load %arg5[%c0_11, %c0_12] : memref<256x1xi32, #tpu.memory_space<vmem>>, vector<256x1xi32>
    %22 = vector.broadcast %21 : vector<256x1xi32> to vector<256x128xi32>
    %23 = arith.cmpi eq, %20, %22 : vector<256x128xi32>
    %24 = arith.extui %23 : vector<256x128xi1> to vector<256x128xi32>
    %25 = arith.sitofp %24 : vector<256x128xi32> to vector<256x128xf32>
    %c0_13 = arith.constant 0 : index
    %c0_14 = arith.constant 0 : index
    %26 = vector.load %arg6[%c0_13, %c0_14] : memref<2x32xf32, #tpu.memory_space<vmem>>, vector<2x32xf32>
    %cst_15 = arith.constant dense<0.000000e+00> : vector<2x256xf32>
    %27 = tpu.matmul %26, %13, %cst_15 {dimension_numbers = #tpu.dot_dimension_numbers<[1], [0], [0], [1], [0, 0, 1, 1], [], []>} : vector<2x32xf32>, vector<32x256xf32>, vector<2x256xf32> -> vector<2x256xf32>
    %cst_16 = arith.constant dense<0xFF800000> : vector<2xf32>
    %28 = vector.multi_reduction <maximumf>, %27, %cst_16 [1] : vector<2x256xf32> to vector<2xf32>
    %29 = vector.shape_cast %28 : vector<2xf32> to vector<2x1xf32>
    %30 = vector.broadcast %29 : vector<2x1xf32> to vector<2x256xf32>
    %31 = arith.subf %27, %30 : vector<2x256xf32>
    %32 = math.exp %31 : vector<2x256xf32>
    %cst_17 = arith.constant dense<0.000000e+00> : vector<2x128xf32>
    %33 = tpu.matmul %32, %25, %cst_17 {dimension_numbers = #tpu.dot_dimension_numbers<[1], [0], [0], [1], [0, 0, 1, 1], [], []>} : vector<2x256xf32>, vector<256x128xf32>, vector<2x128xf32> -> vector<2x128xf32>
    %cst_18 = arith.constant 1.000000e-30 : f32
    %34 = vector.broadcast %cst_18 : f32 to vector<2x128xf32>
    %35 = arith.maximumf %33, %34 : vector<2x128xf32>
    %36 = tpu.reciprocal %35 {approx = true} : vector<2x128xf32> -> vector<2x128xf32>
    %cst_19 = arith.constant dense<0.000000e+00> : vector<32x256xf32>
    %37 = tpu.matmul %1, %19, %cst_19 {dimension_numbers = #tpu.dot_dimension_numbers<[1], [0], [0], [1], [0, 0, 1, 1], [], []>} : vector<32x128xf32>, vector<128x256xf32>, vector<32x256xf32> -> vector<32x256xf32>
    %38 = arith.mulf %37, %13 : vector<32x256xf32>
    %cst_20 = arith.constant dense<0.000000e+00> : vector<256xf32>
    %39 = vector.multi_reduction <add>, %38, %cst_20 [0] : vector<32x256xf32> to vector<256xf32>
    %40 = vector.shape_cast %39 : vector<256xf32> to vector<1x256xf32>
    %cst_21 = arith.constant 2.000000e+00 : f32
    %41 = vector.broadcast %cst_21 : f32 to vector<1x256xf32>
    %42 = arith.mulf %41, %40 : vector<1x256xf32>
    %43 = vector.broadcast %42 : vector<1x256xf32> to vector<32x256xf32>
    %44 = arith.mulf %43, %13 : vector<32x256xf32>
    %45 = arith.subf %37, %44 : vector<32x256xf32>
    %46 = vector.extract_strided_slice %32 {offsets = [0, 0], sizes = [1, 256], strides = [1, 1]} : vector<2x256xf32> to vector<1x256xf32>
    %47 = vector.broadcast %46 : vector<1x256xf32> to vector<32x256xf32>
    %48 = arith.mulf %45, %47 : vector<32x256xf32>
    %cst_22 = arith.constant dense<0.000000e+00> : vector<32x128xf32>
    %49 = tpu.matmul %48, %25, %cst_22 {dimension_numbers = #tpu.dot_dimension_numbers<[1], [0], [0], [1], [0, 0, 1, 1], [], []>} : vector<32x256xf32>, vector<256x128xf32>, vector<32x128xf32> -> vector<32x128xf32>
    %50 = vector.extract_strided_slice %36 {offsets = [0, 0], sizes = [1, 128], strides = [1, 1]} : vector<2x128xf32> to vector<1x128xf32>
    %51 = vector.broadcast %50 : vector<1x128xf32> to vector<32x128xf32>
    %52 = arith.mulf %49, %51 : vector<32x128xf32>
    %53 = math.tanh %52 : vector<32x128xf32>
    %c32 = arith.constant 32 : index
    %c0_23 = arith.constant 0 : index
    %54 = vector.load %arg12[%c32, %c0_23] : memref<96x128xf32, #tpu.memory_space<vmem>>, vector<32x128xf32>
    tpu.vector_store %arg12[%c32, %c0_23], %53 {strides = array<i32>} : memref<96x128xf32, #tpu.memory_space<vmem>>, vector<32x128xf32>,
    %cst_24 = arith.constant dense<0.000000e+00> : vector<32x256xf32>
    %55 = tpu.matmul %53, %19, %cst_24 {dimension_numbers = #tpu.dot_dimension_numbers<[1], [0], [0], [1], [0, 0, 1, 1], [], []>} : vector<32x128xf32>, vector<128x256xf32>, vector<32x256xf32> -> vector<32x256xf32>
    %56 = arith.mulf %55, %13 : vector<32x256xf32>
    %cst_25 = arith.constant dense<0.000000e+00> : vector<256xf32>
    %57 = vector.multi_reduction <add>, %56, %cst_25 [0] : vector<32x256xf32> to vector<256xf32>
    %58 = vector.shape_cast %57 : vector<256xf32> to vector<1x256xf32>
    %cst_26 = arith.constant 2.000000e+00 : f32
    %59 = vector.broadcast %cst_26 : f32 to vector<1x256xf32>
    %60 = arith.mulf %59, %58 : vector<1x256xf32>
    %61 = vector.broadcast %60 : vector<1x256xf32> to vector<32x256xf32>
    %62 = arith.mulf %61, %13 : vector<32x256xf32>
    %63 = arith.subf %55, %62 : vector<32x256xf32>
    %64 = vector.extract_strided_slice %32 {offsets = [1, 0], sizes = [1, 256], strides = [1, 1]} : vector<2x256xf32> to vector<1x256xf32>
    %65 = vector.broadcast %64 : vector<1x256xf32> to vector<32x256xf32>
    %66 = arith.mulf %63, %65 : vector<32x256xf32>
    %cst_27 = arith.constant dense<0.000000e+00> : vector<32x128xf32>
    %67 = tpu.matmul %66, %25, %cst_27 {dimension_numbers = #tpu.dot_dimension_numbers<[1], [0], [0], [1], [0, 0, 1, 1], [], []>} : vector<32x256xf32>, vector<256x128xf32>, vector<32x128xf32> -> vector<32x128xf32>
    %68 = vector.extract_strided_slice %36 {offsets = [1, 0], sizes = [1, 128], strides = [1, 1]} : vector<2x128xf32> to vector<1x128xf32>
    %69 = vector.broadcast %68 : vector<1x128xf32> to vector<32x128xf32>
    %70 = arith.mulf %67, %69 : vector<32x128xf32>
    %71 = math.tanh %70 : vector<32x128xf32>
    %c64 = arith.constant 64 : index
    %c0_28 = arith.constant 0 : index
    %72 = vector.load %arg12[%c64, %c0_28] : memref<96x128xf32, #tpu.memory_space<vmem>>, vector<32x128xf32>
    tpu.vector_store %arg12[%c64, %c0_28], %71 {strides = array<i32>} : memref<96x128xf32, #tpu.memory_space<vmem>>, vector<32x128xf32>,
    %c0_29 = arith.constant 0 : index
    %c0_30 = arith.constant 0 : index
    %73 = vector.load %arg12[%c0_29, %c0_30] : memref<96x128xf32, #tpu.memory_space<vmem>>, vector<96x128xf32>
    %74 = arith.mulf %73, %73 : vector<96x128xf32>
    %cst_31 = arith.constant dense<0.000000e+00> : vector<128xf32>
    %75 = vector.multi_reduction <add>, %74, %cst_31 [0] : vector<96x128xf32> to vector<128xf32>
    %76 = vector.shape_cast %75 : vector<128xf32> to vector<1x128xf32>
    %cst_32 = arith.constant 1.000000e-24 : f32
    %77 = vector.broadcast %cst_32 : f32 to vector<1x128xf32>
    %78 = arith.maximumf %76, %77 : vector<1x128xf32>
    %79 = math.rsqrt %78 : vector<1x128xf32>
    %80 = vector.broadcast %79 : vector<1x128xf32> to vector<96x128xf32>
    %81 = arith.mulf %73, %80 : vector<96x128xf32>
    %c0_33 = arith.constant 0 : index
    %c0_34 = arith.constant 0 : index
    %82 = vector.load %arg7[%c0_33, %c0_34] : memref<64x96xf32, #tpu.memory_space<vmem>>, vector<64x96xf32>
    %83 = arith.mulf %82, %82 : vector<64x96xf32>
    %cst_35 = arith.constant dense<0.000000e+00> : vector<64xf32>
    %84 = vector.multi_reduction <add>, %83, %cst_35 [1] : vector<64x96xf32> to vector<64xf32>
    %85 = vector.shape_cast %84 : vector<64xf32> to vector<64x1xf32>
    %cst_36 = arith.constant 1.000000e-24 : f32
    %86 = vector.broadcast %cst_36 : f32 to vector<64x1xf32>
    %87 = arith.maximumf %85, %86 : vector<64x1xf32>
    %88 = math.rsqrt %87 : vector<64x1xf32>
    %89 = vector.broadcast %88 : vector<64x1xf32> to vector<64x96xf32>
    %90 = arith.mulf %82, %89 : vector<64x96xf32>
    %cst_37 = arith.constant dense<0.000000e+00> : vector<64x128xf32>
    %91 = tpu.matmul %90, %81, %cst_37 {dimension_numbers = #tpu.dot_dimension_numbers<[1], [0], [0], [1], [0, 0, 1, 1], [], []>} : vector<64x96xf32>, vector<96x128xf32>, vector<64x128xf32> -> vector<64x128xf32>
    %cst_38 = arith.constant dense<0xFF800000> : vector<128xf32>
    %92 = vector.multi_reduction <maximumf>, %91, %cst_38 [0] : vector<64x128xf32> to vector<128xf32>
    %93 = vector.shape_cast %92 : vector<128xf32> to vector<1x128xf32>
    %94 = vector.broadcast %93 : vector<1x128xf32> to vector<64x128xf32>
    %95 = arith.subf %91, %94 : vector<64x128xf32>
    %96 = math.exp %95 : vector<64x128xf32>
    %cst_39 = arith.constant dense<0.000000e+00> : vector<128xf32>
    %97 = vector.multi_reduction <add>, %96, %cst_39 [0] : vector<64x128xf32> to vector<128xf32>
    %98 = vector.shape_cast %97 : vector<128xf32> to vector<1x128xf32>
    %99 = tpu.reciprocal %98 {approx = true} : vector<1x128xf32> -> vector<1x128xf32>
    %100 = vector.broadcast %99 : vector<1x128xf32> to vector<64x128xf32>
    %101 = arith.mulf %96, %100 : vector<64x128xf32>
    %c0_40 = arith.constant 0 : index
    %c0_41 = arith.constant 0 : index
    %102 = vector.load %arg8[%c0_40, %c0_41] : memref<96x64xf32, #tpu.memory_space<vmem>>, vector<96x64xf32>
    %cst_42 = arith.constant dense<0.000000e+00> : vector<96x128xf32>
    %103 = tpu.matmul %102, %101, %cst_42 {dimension_numbers = #tpu.dot_dimension_numbers<[1], [0], [0], [1], [0, 0, 1, 1], [], []>} : vector<96x64xf32>, vector<64x128xf32>, vector<96x128xf32> -> vector<96x128xf32>
    %104 = arith.subf %73, %103 : vector<96x128xf32>
    %c0_43 = arith.constant 0 : index
    %c0_44 = arith.constant 0 : index
    %105 = vector.load %arg9[%c0_43, %c0_44] : memref<96x96xf32, #tpu.memory_space<vmem>>, vector<96x96xf32>
    %cst_45 = arith.constant dense<0.000000e+00> : vector<96x128xf32>
    %106 = tpu.matmul %105, %104, %cst_45 {dimension_numbers = #tpu.dot_dimension_numbers<[1], [0], [0], [1], [0, 0, 1, 1], [], []>} : vector<96x96xf32>, vector<96x128xf32>, vector<96x128xf32> -> vector<96x128xf32>
    %c0_46 = arith.constant 0 : index
    %c0_47 = arith.constant 0 : index
    %107 = vector.load %arg10[%c0_46, %c0_47] : memref<96x1xf32, #tpu.memory_space<vmem>>, vector<96x1xf32>
    %108 = vector.broadcast %107 : vector<96x1xf32> to vector<96x128xf32>
    %109 = arith.addf %106, %108 : vector<96x128xf32>
    %110 = arith.negf %109 : vector<96x128xf32>
    %111 = math.exp %110 : vector<96x128xf32>
    %cst_48 = arith.constant 1.000000e+00 : f32
    %112 = vector.broadcast %cst_48 : f32 to vector<96x128xf32>
    %113 = arith.addf %112, %111 : vector<96x128xf32>
    %114 = arith.divf %112, %113 : vector<96x128xf32>
    %115 = arith.mulf %114, %73 : vector<96x128xf32>
    %cst_49 = arith.constant 1.000000e+00 : f32
    %116 = vector.broadcast %cst_49 : f32 to vector<96x128xf32>
    %117 = arith.subf %116, %114 : vector<96x128xf32>
    %118 = arith.mulf %117, %104 : vector<96x128xf32>
    %119 = arith.addf %115, %118 : vector<96x128xf32>
    %c0_50 = arith.constant 0 : index
    %c0_51 = arith.constant 0 : index
    %120 = vector.load %arg11[%c0_50, %c0_51] : memref<96x128xf32, #tpu.memory_space<vmem>>, vector<96x128xf32>
    tpu.vector_store %arg11[%c0_50, %c0_51], %119 {strides = array<i32>} : memref<96x128xf32, #tpu.memory_space<vmem>>, vector<96x128xf32>,
    return
  }
  func.func @transform_0(%arg0: i32) -> (i32, i32) {
    %c0_i32 = arith.constant 0 : i32
    %c0_i32_0 = arith.constant 0 : i32
    %c0_i32_1 = arith.constant 0 : i32
    return %c0_i32, %c0_i32_0 : i32, i32
  }
  func.func @transform_1(%arg0: i32) -> (i32, i32) {
    %c0_i32 = arith.constant 0 : i32
    %c0_i32_0 = arith.constant 0 : i32
    %c0_i32_1 = arith.constant 0 : i32
    return %c0_i32, %c0_i32_0 : i32, i32
  }
  func.func @transform_2(%arg0: i32) -> (i32, i32) {
    %c0_i32 = arith.constant 0 : i32
    %c0_i32_0 = arith.constant 0 : i32
    %c0_i32_1 = arith.constant 0 : i32
    return %c0_i32, %c0_i32_0 : i32, i32
  }
  func.func @transform_3(%arg0: i32) -> (i32, i32) {
    %c0_i32 = arith.constant 0 : i32
    %c0_i32_0 = arith.constant 0 : i32
    %c0_i32_1 = arith.constant 0 : i32
    return %c0_i32, %c0_i32_0 : i32, i32
  }
  func.func @transform_4(%arg0: i32) -> (i32, i32) {
    %c0_i32 = arith.constant 0 : i32
    %c0_i32_0 = arith.constant 0 : i32
    %c0_i32_1 = arith.constant 0 : i32
    return %c0_i32, %c0_i32_0 : i32, i32
  }
  func.func @transform_5(%arg0: i32) -> (i32, i32) {
    %c0_i32 = arith.constant 0 : i32
    %c0_i32_0 = arith.constant 0 : i32
    %c0_i32_1 = arith.constant 0 : i32
    return %c0_i32, %c0_i32_0 : i32, i32
  }
  func.func @transform_6(%arg0: i32) -> (i32, i32) {
    %c0_i32 = arith.constant 0 : i32
    %c0_i32_0 = arith.constant 0 : i32
    %c0_i32_1 = arith.constant 0 : i32
    return %c0_i32, %c0_i32_0 : i32, i32
  }
  func.func @transform_7(%arg0: i32) -> (i32, i32) {
    %c0_i32 = arith.constant 0 : i32
    %c0_i32_0 = arith.constant 0 : i32
    %c0_i32_1 = arith.constant 0 : i32
    return %c0_i32, %c0_i32_0 : i32, i32
  }
  func.func @transform_8(%arg0: i32) -> (i32, i32) {
    %c0_i32 = arith.constant 0 : i32
    %c0_i32_0 = arith.constant 0 : i32
    %c0_i32_1 = arith.constant 0 : i32
    return %c0_i32, %c0_i32_0 : i32, i32
  }
  func.func @transform_9(%arg0: i32) -> (i32, i32) {
    %c0_i32 = arith.constant 0 : i32
    %c0_i32_0 = arith.constant 0 : i32
    %c0_i32_1 = arith.constant 0 : i32
    return %c0_i32, %c0_i32_0 : i32, i32
  }
  func.func @transform_10(%arg0: i32) -> (i32, i32) {
    %c0_i32 = arith.constant 0 : i32
    %c0_i32_0 = arith.constant 0 : i32
    %c0_i32_1 = arith.constant 0 : i32
    return %c0_i32, %c0_i32_0 : i32, i32
  }
}

</mosaic_0001>

<bundles_post_ra>
// kernel: graph_attention_forward.1
= control target key start
LH: loop header
LB: loop body
LE: loop exit
PB: predicated region body
PF: predicated region fallthrough
CT: control target
= control target key end

     0   :  { %15 = vsyncpa [#allocation4], 0  ;;  %s4508_s0 = inlined_call_operand.vmem [shape: f32[32,128], index: 0, kind: input, shape index: {}]   ;;  %s4509_s1 = inlined_call_operand.hbm [shape: f32[32,256], index: 1, kind: input, shape index: {}]   ;;  %s4510_s2 = inlined_call_operand.vmem [shape: f32[32,32], index: 2, kind: input, shape index: {}]   ;;  %s4511_s3 = inlined_call_operand.vmem [shape: s32[1,256], index: 3, kind: input, shape index: {}]   ;;  %s4512_s4 = inlined_call_operand.vmem [shape: s32[256,1], index: 4, kind: input, shape index: {}]   ;;  %s4513_s5 = inlined_call_operand.vmem [shape: f32[2,32], index: 5, kind: input, shape index: {}]   ;;  %s4514_s6 = inlined_call_operand.vmem [shape: f32[64,96], index: 6, kind: input, shape index: {}]   ;;  %s4515_s7 = inlined_call_operand.vmem [shape: f32[96,64], index: 7, kind: input, shape index: {}]   ;;  %s4516_s8 = inlined_call_operand.vmem [shape: f32[96,96], index: 8, kind: input, shape index: {}]   ;;  %s4517_s9 = inlined_call_operand.vmem [shape: f32[96,1], index: 9, kind: input, shape index: {}]   ;;  %s4518_s10 = inlined_call_operand.hbm [shape: f32[96,128], index: 10, kind: output, shape index: {}]  }
   0x1   :  { %16 = vsyncpa [#allocation5], 0  ;;  %s2883_s13 = smov [#allocation3]  }
   0x2   :  { %s24_s14 = sshll.u32 %s2883_s13, 4  ;;  %s25_s14 = int_to_ptr.vmem [resolvable:$true] %s24_s14 }
   0x3   :  { %s2847_s15 = scalar_lea.vmem %s25_s14, 1024  ;;  %p2852_p1 = scmp.lt.s32.totalorder %s25_s14, %s25_s14 }
   0x4   :  { %p2848_p0 = scmp.ne.s32.totalorder %s25_s14, %s2847_s15  ;;  %p2853_p2 = scmp.lt.s32.totalorder %s2847_s15, %s2847_s15 }
   0x6   :  { %p2854_p3 = por %p2853_p2, %p2852_p1 }
   0x8   :  { %p2855_p4 = pnand %p2854_p3, %p2848_p0 }
   0xa   :  { %2858 = shalt.err (!%p2855_p4)
}
   0xb   :  { %s2884_s16 = smov 256   ;;  %s2885_s17 = smov 16  }
   0xc   :  { %30 = dma.hbm_to_vmem [thread:$0]  %s4509_s1, 1024, %s25_s14, [#allocation4], %s2884_s16, %s2884_s16, %s2885_s17  }
   0xd   :  { %2879 = dma.done.wait [#allocation4], 1024  }
   0xe   :  { %2880 = vsyncadd [#allocation4], 4294966272  ;;  %v4554_v0 = vmov 0.0   ;;  %v73_v1 = vld [vmem:[#allocation3 + $0x38] sm:$0xff]  ;;  %v72_v2 = vld [vmem:[#allocation3 + $0x30] sm:$0xff]  ;;  %vm74_vm0 = vcmask 261120  }
   0xf   :  { %151 = vmatprep.mubr.f32.mxu0 %v4554_v0  ;;  %630 = vmatprep.mubr.f32.mxu1 %v4554_v0  ;;  %v71_v3 = vld [vmem:[#allocation3 + $0x28] sm:$0xff]  ;;  %v70_v4 = vld [vmem:[#allocation3 + $0x20] sm:$0xff]  ;;  %v69_v5 = vld [vmem:[#allocation3 + $0x18] sm:$0xff]  ;;  %v2887_v13 = vmov 0   ;;  %vm4521_vm1 = vcmask 785408  }
  0x10   :  { %111 = vmatprep.subr.mxu0 %v73_v1  ;;  %v68_v6 = vld [vmem:[#allocation3 + $0x10] sm:$0xff]  ;;  %v67_v7 = vld [vmem:[#allocation3 + $0x8] sm:$0xff]  ;;  %v66_v8 = vld [vmem:[#allocation3] sm:$0xff]  ;;  %2714 = vset.pattern.permute.xlu0 %v2887_v13 }
  0x11   :  { %112 = vmatpush1.msra.mxu0 %v72_v2  ;;  %v62_v9 = vld [vmem:[%s4510_s2] sm:$0xff]  ;;  %v63_v10 = vld [vmem:[%s4510_s2 + $0x8] sm:$0xff]  ;;  %v64_v11 = vld [vmem:[%s4510_s2 + $0x10] sm:$0xff]  ;;  %2715 = vset.pattern.permute.xlu1 %v2887_v13 }
  0x12   :  { %113 = vmatprep.subr.mxu0 %v71_v3  ;;  %v65_v12 = vld [vmem:[%s4510_s2 + $0x18] sm:$0xff]  ;;  %v367_v16 = vld [vmem:[%s4512_s4 + $0xe8] sm:$0xff]  ;;  %v366_v17 = vld [vmem:[%s4512_s4 + $0xe0] sm:$0xff] }
  0x13   :  { %114 = vmatpush1.msra.mxu0 %v70_v4  ;;  %v369_v14 = vld [vmem:[%s4512_s4 + $0xf8] sm:$0xff]  ;;  %v364_v20 = vld [vmem:[%s4512_s4 + $0xd0] sm:$0xff]  ;;  %v363_v22 = vld [vmem:[%s4512_s4 + $0xc8] sm:$0xff] }
  0x14   :  { %115 = vmatprep.subr.mxu0 %v69_v5  ;;  %464 = vperm.xlu0 %2714, %v369_v14   ;;  %v353_v15 = vld [vmem:[%s4512_s4 + $0x78] sm:$0xff]  ;;  %v348_v21 = vld [vmem:[%s4512_s4 + $0x50] sm:$0xff]  ;;  %v347_v23 = vld [vmem:[%s4512_s4 + $0x48] sm:$0xff] }
  0x15   :  { %116 = vmatpush1.msra.mxu0 %v68_v6  ;;  %v365_v18 = vld [vmem:[%s4512_s4 + $0xd8] sm:$0xff]  ;;  %v362_v24 = vld [vmem:[%s4512_s4 + $0xc0] sm:$0xff]  ;;  %v344_v28 = vld [vmem:[%s4512_s4 + $0x30] sm:$0xff] }
  0x16   :  { %117 = vmatprep.subr.mxu0 %v67_v7  ;;  %v349_v19 = vld [vmem:[%s4512_s4 + $0x58] sm:$0xff]  ;;  %v346_v25 = vld [vmem:[%s4512_s4 + $0x40] sm:$0xff]  ;;  %v359_v29 = vld [vmem:[%s4512_s4 + $0xa8] sm:$0xff] }
  0x17   :  { %118 = vmatpush1.msra.mxu0 %v66_v8  ;;  %v361_v26 = vld [vmem:[%s4512_s4 + $0xb8] sm:$0xff]  ;;  %v343_v30 = vld [vmem:[%s4512_s4 + $0x28] sm:$0xff]  ;;  %v358_v31 = vld [vmem:[%s4512_s4 + $0xa0] sm:$0xff] }
  0x18   :  { %2109 = vmatmul.mubr.msk.f32.vlgmr.msra.gmra.mxu0 %vm74_vm0, %v62_v9  ;;  %416 = vperm.xlu0 %2714, %v353_v15   ;;  %v345_v27 = vld [vmem:[%s4512_s4 + $0x38] sm:$0xff]  ;;  %v368_v33 = vld [vmem:[%s4512_s4 + $0xf0] sm:$0xff]  ;;  %v355_v36 = vld [vmem:[%s4512_s4 + $0x88] sm:$0xff]  ;;  %v214_v15 = vlaneseq }
  0x19   :  { %157 = vmatprep.mubr.f32.mxu0 %v4554_v0  ;;  %v357_v32 = vld [vmem:[%s4512_s4 + $0x98] sm:$0xff]  ;;  %v356_v34 = vld [vmem:[%s4512_s4 + $0x90] sm:$0xff]  ;;  %461 = vperm.xlu1 %2715, %v368_v33   ;;  %v351_v37 = vld [vmem:[%s4512_s4 + $0x68] sm:$0xff] }
  0x1a   :  { %v352_v35 = vld [vmem:[%s4512_s4 + $0x70] sm:$0xff]  ;;  %v354_v38 = vld [vmem:[%s4512_s4 + $0x80] sm:$0xff]  ;;  %v341_v42 = vld [vmem:[%s4512_s4 + $0x18] sm:$0xff] }
  0x1b   :  { %v350_v39 = vld [vmem:[%s4512_s4 + $0x60] sm:$0xff]  ;;  %v360_v40 = vld [vmem:[%s4512_s4 + $0xb0] sm:$0xff]  ;;  %v339_v47 = vld [vmem:[%s4512_s4 + $0x8] sm:$0xff] }
  0x1c   :  { %2110 = vmatmul.mubr.msk.f32.gmra.mxu0 %vm74_vm0, %v63_v10  ;;  %458 = vperm.xlu0 %2714, %v367_v16   ;;  %v342_v41 = vld [vmem:[%s4512_s4 + $0x20] sm:$0xff]  ;;  %v340_v44 = vld [vmem:[%s4512_s4 + $0x10] sm:$0xff]  ;;  %v1279_v8 = vld [vmem:[%s4514_s6 + $0x18] sm:$0xff] }
  0x1d   :  { %163 = vmatprep.mubr.f32.mxu0 %v4554_v0  ;;  %413 = vperm.xlu1 %2715, %v352_v35   ;;  %v1276_v51 = vld [vmem:[%s4514_s6] sm:$0xff]  ;;  %v1278_v60 = vld [vmem:[%s4514_s6 + $0x10] sm:$0xff]  ;;  %v1287_v14 = vmul.f32 %v1279_v8, %v1279_v8  ;;  %v1281_v16 = vld [vmem:[%s4514_s6 + $0x28] sm:$0xff] }
  0x1e   :  { %v1284_v59 = vmul.f32 %v1276_v51, %v1276_v51  ;;  %v1286_v3 = vmul.f32 %v1278_v60, %v1278_v60 }
  0x20   :  { %2111 = vmatmul.mubr.msk.f32.gmra.mxu0 %vm74_vm0, %v64_v11  ;;  %455 = vperm.xlu0 %2714, %v366_v17   ;;  %v1293_v7 = vsel %vm4521_vm1, %v1284_v59, 0.0  ;;  %v1299_v13 = vsel %vm4521_vm1, %v1286_v3, 0.0  ;;  %v1735_v3 = vld [vmem:[%s4517_s9 + $0x40] sm:$0xff] }
  0x21   :  { %169 = vmatprep.mubr.f32.mxu0 %v4554_v0  ;;  %410 = vperm.xlu1 %2715, %v351_v37  }
  0x24   :  { %2112 = vmatmul.mubr.msk.f32.gmra.mxu0 %vm74_vm0, %v65_v12  ;;  %452 = vperm.xlu0 %2714, %v365_v18  }
  0x25   :  { %407 = vperm.xlu1 %2715, %v350_v39  }
  0x28   :  { %404 = vperm.xlu0 %2714, %v349_v19   ;;  %v3102_v19 = vand.u32 127, %v214_v15 }
  0x29   :  { %437 = vperm.xlu1 %2715, %v360_v40  }
  0x2c   :  { %449 = vperm.xlu0 %2714, %v364_v20  }
  0x2d   :  { %383 = vperm.xlu1 %2715, %v342_v41  }
  0x30   :  { %401 = vperm.xlu0 %2714, %v348_v21  }
  0x31   :  { %380 = vperm.xlu1 %2715, %v341_v42  }
  0x34   :  { %446 = vperm.xlu0 %2714, %v363_v22   ;;  %v1302_v22 = vsel %vm4521_vm1, %v1287_v14, 0.0 }
  0x35   :  { %377 = vperm.xlu1 %2715, %v340_v44   ;;  %v231_v44 = vld [vmem:[%s4511_s3] sm:$0x3] }
  0x38   :  { %398 = vperm.xlu0 %2714, %v347_v23   ;;  %v1289_v23 = vmul.f32 %v1281_v16, %v1281_v16  ;;  %v52_v16 = vld [vmem:[%s4508_s0 + $0x10] sm:$0xff] }
  0x39   :  { %374 = vperm.xlu1 %2715, %v339_v47  }
  0x3c   :  { %443 = vperm.xlu0 %2714, %v362_v24   ;;  %v1283_v24 = vld [vmem:[%s4514_s6 + $0x38] sm:$0xff] }
  0x40   :  { %395 = vperm.xlu0 %2714, %v346_v25  }
  0x44   :  { %440 = vperm.xlu0 %2714, %v361_v26  }
  0x48   :  { %392 = vperm.xlu0 %2714, %v345_v27   ;;  %v1291_v27 = vmul.f32 %v1283_v24, %v1283_v24 }
  0x4a   :  { %v1314_v37 = vsel %vm4521_vm1, %v1291_v27, 0.0 }
  0x4c   :  { %389 = vperm.xlu0 %2714, %v344_v28  }
  0x50   :  { %434 = vperm.xlu0 %2714, %v359_v29  }
  0x54   :  { %386 = vperm.xlu0 %2714, %v343_v30  }
  0x58   :  { %431 = vperm.xlu0 %2714, %v358_v31   ;;  %v1308_v31 = vsel %vm4521_vm1, %v1289_v23, 0.0 }
  0x5c   :  { %428 = vperm.xlu0 %2714, %v357_v32   ;;  %v4556_v32 = vmov 1.0  }
  0x60   :  { %425 = vperm.xlu0 %2714, %v356_v34  }
  0x64   :  { %422 = vperm.xlu0 %2714, %v355_v36  }
  0x68   :  { %419 = vperm.xlu0 %2714, %v354_v38   ;;  %v3126_v38 = vshrl.u32 %v214_v15, 7 }
  0x6a   :  { %v3129_v41 = vsub.s32 1, %v3126_v38  ;;  %v3137_v47 = vsub.s32 0, %v3126_v38  ;;  %v3186_v60 = vadd.s32 104, %v3126_v38  ;;  %v3316_v8 = vadd.s32 40, %v3126_v38 }
  0x6b   :  { %v3369_v14 = vadd.s32 16, %v3126_v38  ;;  %v3384_v15 = vadd.s32 8, %v3126_v38 }
  0x6c   :  { %4582 = vst [vmem:[#allocation9_spill] sm:$0xff] %v3129_v41 }
  0x87   :  { %1294 = vadd.xlane.f32.xlu0 %v1293_v7  ;;  %v1737_v7 = vld [vmem:[%s4517_s9 + $0x50] sm:$0xff] }
  0x8b   :  { %1300 = vadd.xlane.f32.xlu0 %v1299_v13  ;;  %v51_v13 = vld [vmem:[%s4508_s0 + $0x8] sm:$0xff] }
  0x8f   :  { %1303 = vadd.xlane.f32.xlu0 %v1302_v22  ;;  %v3108_v28 = vpop.permute.xlu0 %464 }
  0x90   :  { %vm4520_vm2 = vcmp.eq.s32.totalorder %v3102_v19, %v3108_v28 }
  0x91   :  { %2382 = vmatprep.subr.msk.mxu0 %vm4520_vm2, %v4556_v32 }
  0x93   :  { %1309 = vadd.xlane.f32.xlu0 %v1308_v31  ;;  %v3117_v35 = vpop.permute.xlu0 %416 }
  0x94   :  { %vm4519_vm3 = vcmp.eq.s32.totalorder %v3102_v19, %v3117_v35 }
  0x95   :  { %2383 = vmatpush3.msk.msra.mxu0 %vm4519_vm3, %v4556_v32 }
  0x97   :  { %1315 = vadd.xlane.f32.xlu0 %v1314_v37  ;;  %v3612_v37 = vpop.permute.xlu1 %461 }
  0xd8   :  { %v3058_v43 = vpop.f32.mrf.mxu0 }
  0xd9   :  { %v176_v52 = vmul.f32 %v3058_v43, %v3058_v43 }
  0xda   :  { %v3063_v45 = vpop.f32.mrf.mxu0 }
  0xdb   :  { %v177_v56 = vmul.f32 %v3063_v45, %v3063_v45 }
  0xdc   :  { %v3065_v46 = vpop.f32.mrf.mxu0 }
  0xdd   :  { %v178_v49 = vmul.f32 %v3065_v46, %v3065_v46 }
  0xde   :  { %v3070_v48 = vpop.f32.mrf.mxu0 }
  0xdf   :  { %v179_v53 = vmul.f32 %v3070_v48, %v3070_v48  ;;  %v184_v57 = vadd.f32 %v178_v49, %v176_v52 }
  0xe0   :  { %v3074_v50 = vpop.f32.mrf.mxu0 }
  0xe1   :  { %v180_v54 = vmul.f32 %v3074_v50, %v3074_v50  ;;  %v193_v62 = vadd.f32 %v179_v53, %v177_v56  ;;  %v3150_v53 = vadd.s32 120, %v3126_v38 }
  0xe2   :  { %v3085_v55 = vpop.f32.mrf.mxu0 }
  0xe3   :  { %v181_v58 = vmul.f32 %v3085_v55, %v3085_v55  ;;  %v185_v63 = vadd.f32 %v184_v57, %v180_v54  ;;  %v3153_v54 = vrot.slane %v231_v44, %v3129_v41  ;;  %v3160_v57 = vrot.slane %v231_v44, %v3137_v47 }
  0xe4   :  { %v171_v61 = vpop.f32.mrf.mxu0 }
  0xe5   :  { %v182_v1 = vmul.f32 %v171_v61, %v171_v61  ;;  %v194_v4 = vadd.f32 %v193_v62, %v181_v58  ;;  %vm271_vm4 = vcmp.eq.s32.totalorder %v3150_v53, %v3153_v54  ;;  %vm270_vm5 = vcmp.eq.s32.totalorder %v3150_v53, %v3160_v57 }
  0xe6   :  { %v173_v2 = vpop.f32.mrf.mxu0  ;;  %vm267_vm8 = vcmp.eq.s32.totalorder %v3186_v60, %v3153_v54  ;;  %vm266_vm9 = vcmp.eq.s32.totalorder %v3186_v60, %v3160_v57  ;;  %v3230_v62 = vadd.s32 80, %v3126_v38 }
  0xe7   :  { %v186_v5 = vadd.f32 %v185_v63, %v182_v1  ;;  %v183_v6 = vmul.f32 %v173_v2, %v173_v2  ;;  %v1733_v63 = vld [vmem:[%s4517_s9 + $0x30] sm:$0xff]  ;;  %v3248_v1 = vadd.s32 72, %v3126_v38 }
  0xe8   :  { %vm4537_vm14 = vcmp.eq.s32.totalorder %v3230_v62, %v3153_v54  ;;  %vm4522_vm15 = vcmp.eq.s32.totalorder %v3230_v62, %v3160_v57 }
  0xe9   :  { %v187_v9 = vrot.slane %v186_v5, 4  ;;  %v195_v10 = vadd.f32 %v194_v4, %v183_v6  ;;  %v3281_v4 = vadd.s32 56, %v3126_v38  ;;  %vm4524_vm3 = vcmp.eq.s32.totalorder %v3248_v1, %v3160_v57 }
  0xea   :  { %v3298_v6 = vadd.s32 48, %v3126_v38 }
  0xeb   :  { %v188_v11 = vadd.f32 %v187_v9, %v186_v5  ;;  %v196_v12 = vrot.slane %v195_v10, 4  ;;  %v3289_v5 = vpop.permute.xlu0 %458  ;;  %v50_v9 = vld [vmem:[%s4508_s0] sm:$0xff] }
  0xed   :  { %v189_v17 = vrot.slane %v188_v11, 2  ;;  %v197_v18 = vadd.f32 %v196_v12, %v195_v10  ;;  %v3334_v10 = vadd.s32 32, %v3126_v38  ;;  %v3351_v12 = vadd.s32 24, %v3126_v38 }
  0xef   :  { %v190_v20 = vadd.f32 %v189_v17, %v188_v11  ;;  %v198_v21 = vrot.slane %v197_v18, 2  ;;  %v3342_v11 = vpop.permute.xlu0 %455 }
  0xf1   :  { %v191_v25 = vrot.slane %v190_v20, 1  ;;  %v199_v26 = vadd.f32 %v198_v21, %v197_v18  ;;  %v53_v18 = vld [vmem:[%s4508_s0 + $0x18] sm:$0xff] }
  0xf3   :  { %v192_v29 = vadd.f32 %v191_v25, %v190_v20  ;;  %v200_v30 = vrot.slane %v199_v26, 1  ;;  %v3395_v17 = vpop.permute.xlu0 %452 }
  0xf5   :  { %v202_v33 = vmax.f32 %v192_v29, 1e-24  ;;  %v201_v34 = vadd.f32 %v200_v30, %v199_v26 }
  0xf7   :  { %v203_v36 = vmax.f32 %v201_v34, 1e-24  ;;  %2716 = vrsqrt.f32 %v202_v33  ;;  %v3436_v20 = vpop.permute.xlu0 %404 }
  0xf9   :  { %2718 = vrsqrt.f32 %v203_v36 }
  0xfa   :  { %2720 = vtanh.f32 %v50_v9  ;;  %v3831_v9 = vld [vmem:[%s4514_s6 + $0x20] sm:$0xff] }
  0xfb   :  { %2722 = vtanh.f32 %v51_v13  ;;  %v3464_v23 = vpop.permute.xlu0 %449  ;;  %4608 = vst [vmem:[#allocation19_spill] sm:$0xff] %v3831_v9  ;;  %v3839_v13 = vld [vmem:[%s4514_s6 + $0x30] sm:$0xff] }
  0xfc   :  { %2724 = vtanh.f32 %v52_v16  ;;  %4610 = vst [vmem:[#allocation20_spill] sm:$0xff] %v3839_v13 }
  0xfd   :  { %2726 = vtanh.f32 %v53_v18  ;;  %v1727_v18 = vld [vmem:[%s4517_s9] sm:$0xff] }
  0xff   :  { %v3495_v25 = vpop.permute.xlu0 %401 }
 0x103   :  { %v3526_v27 = vpop.permute.xlu0 %446 }
 0x104   :  { %v2717_v39 = vpop.eup %2716 }
 0x105   :  { %v3139_v49 = vmul.f32 %v2717_v39, %v171_v61  ;;  %v3147_v52 = vmul.f32 %v2717_v39, %v3074_v50  ;;  %v3167_v50 = vadd.s32 112, %v3126_v38  ;;  %v3178_v59 = vmul.f32 %v2717_v39, %v3058_v43 }
 0x106   :  { %v2719_v40 = vpop.eup %2718  ;;  %v3195_v43 = vadd.s32 96, %v3126_v38  ;;  %v3214_v61 = vadd.s32 88, %v3126_v38 }
 0x107   :  { %v3131_v42 = vmul.f32 %v2719_v40, %v173_v2  ;;  %v3143_v51 = vmul.f32 %v2719_v40, %v3085_v55  ;;  %v3157_v56 = vmul.f32 %v2719_v40, %v3070_v48  ;;  %v3164_v55 = vmul.f32 %v2717_v39, %v3065_v46  ;;  %v1728_v48 = vld [vmem:[%s4517_s9 + $0x8] sm:$0xff]  ;;  %v562_v46 = vld [vmem:[%s4513_s5] sm:$0x3]  ;;  %v3438_v21 = vpop.eup %2720  ;;  %v3552_v29 = vpop.permute.xlu0 %398 }
 0x108   :  { %v3171_v58 = vmul.f32 %v2719_v40, %v3063_v45  ;;  %vm269_vm6 = vcmp.eq.s32.totalorder %v3167_v50, %v3153_v54  ;;  %1746 = vperm.xlu0 %2714, %v1728_v48   ;;  %vm268_vm7 = vcmp.eq.s32.totalorder %v3167_v50, %v3160_v57  ;;  %v1731_v45 = vld [vmem:[%s4517_s9 + $0x20] sm:$0xff]  ;;  %vm265_vm10 = vcmp.eq.s32.totalorder %v3195_v43, %v3153_v54  ;;  %v3457_v22 = vpop.eup %2722 }
 0x109   :  { %590 = vmatprep.subr.mxu1 %v3131_v42  ;;  %vm264_vm11 = vcmp.eq.s32.totalorder %v3195_v43, %v3160_v57  ;;  %vm263_vm12 = vcmp.eq.s32.totalorder %v3214_v61, %v3153_v54  ;;  %vm262_vm13 = vcmp.eq.s32.totalorder %v3214_v61, %v3160_v57  ;;  %v3263_v2 = vadd.s32 64, %v3126_v38  ;;  %4583 = vst [vmem:[#allocation10_spill] sm:$0xff] %v3438_v21  ;;  %v3479_v24 = vpop.eup %2724 }
 0x10a   :  { %591 = vmatpush1.msra.mxu1 %v3139_v49  ;;  %4584 = vst [vmem:[#allocation11_spill] sm:$0xff] %v3457_v22  ;;  %4585 = vst [vmem:[#allocation12_spill] sm:$0xff] %v3479_v24  ;;  %v3501_v26 = vpop.eup %2726 }
 0x10b   :  { %592 = vmatprep.subr.mxu1 %v3143_v51  ;;  %vm4525_vm2 = vcmp.eq.s32.totalorder %v3263_v2, %v3153_v54  ;;  %vm4526_vm1 = vcmp.eq.s32.totalorder %v3263_v2, %v3160_v57  ;;  %4586 = vst [vmem:[#allocation13_spill] sm:$0xff] %v3501_v26  ;;  %v3578_v30 = vpop.permute.xlu0 %443 }
 0x10c   :  { %593 = vmatpush1.msra.mxu1 %v3147_v52  ;;  %1761 = vperm.xlu0 %2714, %v1731_v45  }
 0x10d   :  { %594 = vmatprep.subr.mxu1 %v3157_v56 }
 0x10e   :  { %595 = vmatpush1.msra.mxu1 %v3164_v55 }
 0x10f   :  { %596 = vmatprep.subr.mxu1 %v3171_v58  ;;  %v3604_v31 = vpop.permute.xlu0 %395 }
 0x110   :  { %597 = vmatpush1.msra.mxu1 %v3178_v59  ;;  %1771 = vperm.xlu0 %2714, %v1733_v63  }
 0x111   :  { %2177 = vmatmul.mubr.msk.f32.vlgmr.msra.gmra.mxu1 %vm74_vm0, %v562_v46  ;;  %2210 = vmatprep.subr.msk.mxu1 %vm271_vm4, %v4556_v32  ;;  %vm4523_vm0 = vcmp.eq.s32.totalorder %v3248_v1, %v3153_v54 }
 0x112   :  { %2211 = vmatpush1.msk.msra.mxu1 %vm270_vm5, %v4556_v32  ;;  %785 = vmatprep.mubr.f32.mxu1 %v4554_v0 }
 0x113   :  { %2212 = vmatprep.subr.msk.mxu1 %vm269_vm6, %v4556_v32  ;;  %v3606_v33 = vpop.permute.xlu0 %440 }
 0x114   :  { %2213 = vmatpush1.msk.msra.mxu1 %vm268_vm7, %v4556_v32  ;;  %1781 = vperm.xlu0 %2714, %v1735_v3  }
 0x115   :  { %2214 = vmatprep.subr.msk.mxu1 %vm267_vm8, %v4556_v32 }
 0x116   :  { %2215 = vmatpush1.msk.msra.mxu1 %vm266_vm9, %v4556_v32 }
 0x117   :  { %2216 = vmatprep.subr.msk.mxu1 %vm265_vm10, %v4556_v32  ;;  %v3608_v34 = vpop.permute.xlu0 %392 }
 0x118   :  { %2217 = vmatpush1.msk.msra.mxu1 %vm264_vm11, %v4556_v32  ;;  %1791 = vperm.xlu0 %2714, %v1737_v7   ;;  %v3824_v7 = vld [vmem:[%s4514_s6 + $0x8] sm:$0xff] }
 0x119   :  { %2218 = vmatprep.subr.msk.mxu1 %vm263_vm12, %v4556_v32  ;;  %4607 = vst [vmem:[#allocation18_spill] sm:$0xff] %v3824_v7 }
 0x11a   :  { %2219 = vmatpush1.msk.msra.mxu1 %vm262_vm13, %v4556_v32 }
 0x11b   :  { %2220 = vmatprep.subr.msk.mxu1 %vm4537_vm14, %v4556_v32  ;;  %vm240_vm14 = vcmp.eq.s32.totalorder %v3126_v38, %v3160_v57  ;;  %v3610_v36 = vpop.permute.xlu0 %389 }
 0x11c   :  { %2221 = vmatpush1.msk.msra.mxu1 %vm4522_vm15, %v4556_v32  ;;  %vm4527_vm15 = vcmp.eq.s32.totalorder %v3281_v4, %v3153_v54 }
 0x11d   :  { %2222 = vmatprep.subr.msk.mxu1 %vm4523_vm0, %v4556_v32  ;;  %vm4528_vm0 = vcmp.eq.s32.totalorder %v3281_v4, %v3160_v57 }
 0x11e   :  { %2223 = vmatpush1.msk.msra.mxu1 %vm4524_vm3, %v4556_v32  ;;  %vm4529_vm3 = vcmp.eq.s32.totalorder %v3298_v6, %v3153_v54 }
 0x11f   :  { %2224 = vmatprep.subr.msk.mxu1 %vm4525_vm2, %v4556_v32  ;;  %vm4530_vm2 = vcmp.eq.s32.totalorder %v3298_v6, %v3160_v57  ;;  %v3614_v39 = vpop.permute.xlu0 %434 }
 0x120   :  { %2225 = vmatpush1.msk.msra.mxu1 %vm4526_vm1, %v4556_v32  ;;  %vm4531_vm1 = vcmp.eq.s32.totalorder %v3316_v8, %v3153_v54 }
 0x121   :  { %2226 = vmatprep.subr.msk.mxu1 %vm4527_vm15, %v4556_v32  ;;  %vm4532_vm15 = vcmp.eq.s32.totalorder %v3316_v8, %v3160_v57 }
 0x122   :  { %2227 = vmatpush1.msk.msra.mxu1 %vm4528_vm0, %v4556_v32  ;;  %vm4533_vm0 = vcmp.eq.s32.totalorder %v3334_v10, %v3153_v54 }
 0x123   :  { %2228 = vmatprep.subr.msk.mxu1 %vm4529_vm3, %v4556_v32  ;;  %vm4534_vm3 = vcmp.eq.s32.totalorder %v3334_v10, %v3160_v57  ;;  %v3632_v40 = vpop.permute.xlu0 %386 }
 0x124   :  { %2229 = vmatpush1.msk.msra.mxu1 %vm4530_vm2, %v4556_v32  ;;  %vm4535_vm2 = vcmp.eq.s32.totalorder %v3351_v12, %v3153_v54 }
 0x125   :  { %2230 = vmatprep.subr.msk.mxu1 %vm4531_vm1, %v4556_v32  ;;  %vm4536_vm1 = vcmp.eq.s32.totalorder %v3351_v12, %v3160_v57 }
 0x126   :  { %2231 = vmatpush1.msk.msra.mxu1 %vm4532_vm15, %v4556_v32  ;;  %vm245_vm15 = vcmp.eq.s32.totalorder %v3369_v14, %v3153_v54 }
 0x127   :  { %2232 = vmatprep.subr.msk.mxu1 %vm4533_vm0, %v4556_v32  ;;  %vm244_vm0 = vcmp.eq.s32.totalorder %v3369_v14, %v3160_v57  ;;  %v3642_v53 = vpop.permute.xlu0 %431 }
 0x128   :  { %2233 = vmatpush1.msk.msra.mxu1 %vm4534_vm3, %v4556_v32  ;;  %vm243_vm3 = vcmp.eq.s32.totalorder %v3384_v15, %v3153_v54 }
 0x129   :  { %2234 = vmatprep.subr.msk.mxu1 %vm4535_vm2, %v4556_v32  ;;  %vm242_vm2 = vcmp.eq.s32.totalorder %v3384_v15, %v3160_v57  ;;  %v1290_v15 = vmul.f32 %v3839_v13, %v3839_v13 }
 0x12a   :  { %2235 = vmatpush1.msk.msra.mxu1 %vm4536_vm1, %v4556_v32  ;;  %vm241_vm1 = vcmp.eq.s32.totalorder %v3126_v38, %v3153_v54  ;;  %v3624_v38 = vpop.permute.xlu1 %413 }
 0x12b   :  { %2236 = vmatprep.subr.msk.mxu1 %vm245_vm15, %v4556_v32 }
 0x12c   :  { %2237 = vmatpush1.msk.msra.mxu1 %vm244_vm0, %v4556_v32 }
 0x12d   :  { %2238 = vmatprep.subr.msk.mxu1 %vm243_vm3, %v4556_v32 }
 0x12e   :  { %2239 = vmatpush1.msk.msra.mxu1 %vm242_vm2, %v4556_v32  ;;  %v3640_v44 = vpop.permute.xlu1 %410 }
 0x12f   :  { %2240 = vmatprep.subr.msk.mxu1 %vm241_vm1, %v4556_v32 }
 0x130   :  { %2241 = vmatpush1.msk.msra.mxu1 %vm240_vm14, %v4556_v32 }
 0x131   :  { %786 = vmatmul.mubr.f32.vlgmr.msra.gmra.mxu1 %v3438_v21  ;;  %2274 = vmatprep.subr.msk.mxu1 %vm271_vm4, %v4556_v32  ;;  %vm4587_vm4 = vcmp.eq.s32.totalorder %v3230_v62, %v3153_v54 }
 0x132   :  { %791 = vmatprep.mubr.f32.mxu1 %v4554_v0  ;;  %2275 = vmatpush1.msk.msra.mxu1 %vm270_vm5, %v4556_v32  ;;  %vm4588_vm5 = vcmp.eq.s32.totalorder %v3230_v62, %v3160_v57 }
 0x133   :  { %2276 = vmatprep.subr.msk.mxu1 %vm269_vm6, %v4556_v32  ;;  %vm4589_vm6 = vcmp.eq.s32.totalorder %v3248_v1, %v3153_v54 }
 0x134   :  { %2277 = vmatpush1.msk.msra.mxu1 %vm268_vm7, %v4556_v32  ;;  %vm4590_vm7 = vcmp.eq.s32.totalorder %v3248_v1, %v3160_v57 }
 0x135   :  { %792 = vmatmul.mubr.f32.gmra.mxu1 %v3457_v22  ;;  %2278 = vmatprep.subr.msk.mxu1 %vm267_vm8, %v4556_v32  ;;  %vm4591_vm8 = vcmp.eq.s32.totalorder %v3263_v2, %v3153_v54 }
 0x136   :  { %797 = vmatprep.mubr.f32.mxu1 %v4554_v0  ;;  %2279 = vmatpush1.msk.msra.mxu1 %vm266_vm9, %v4556_v32  ;;  %vm4592_vm9 = vcmp.eq.s32.totalorder %v3263_v2, %v3160_v57 }
 0x137   :  { %2280 = vmatprep.subr.msk.mxu1 %vm265_vm10, %v4556_v32  ;;  %vm4593_vm10 = vcmp.eq.s32.totalorder %v3281_v4, %v3153_v54 }
 0x138   :  { %2281 = vmatpush1.msk.msra.mxu1 %vm264_vm11, %v4556_v32  ;;  %vm4594_vm11 = vcmp.eq.s32.totalorder %v3281_v4, %v3160_v57 }
 0x139   :  { %798 = vmatmul.mubr.f32.gmra.mxu1 %v3479_v24  ;;  %2282 = vmatprep.subr.msk.mxu1 %vm263_vm12, %v4556_v32  ;;  %vm4595_vm12 = vcmp.eq.s32.totalorder %v3298_v6, %v3153_v54 }
 0x13a   :  { %803 = vmatprep.mubr.f32.mxu1 %v4554_v0  ;;  %2283 = vmatpush1.msk.msra.mxu1 %vm262_vm13, %v4556_v32  ;;  %vm4596_vm13 = vcmp.eq.s32.totalorder %v3298_v6, %v3160_v57  ;;  %v338_v6 = vld [vmem:[%s4512_s4] sm:$0xff] }
 0x13b   :  { %2284 = vmatprep.subr.msk.mxu1 %vm4587_vm4, %v4556_v32  ;;  %vm4597_vm4 = vcmp.eq.s32.totalorder %v3316_v8, %v3153_v54 }
 0x13c   :  { %2285 = vmatpush1.msk.msra.mxu1 %vm4588_vm5, %v4556_v32  ;;  %vm4598_vm5 = vcmp.eq.s32.totalorder %v3316_v8, %v3160_v57  ;;  %v1285_v8 = vmul.f32 %v3824_v7, %v3824_v7 }
 0x13d   :  { %804 = vmatmul.mubr.f32.gmra.mxu1 %v3501_v26  ;;  %2286 = vmatprep.subr.msk.mxu1 %vm4589_vm6, %v4556_v32  ;;  %vm4599_vm6 = vcmp.eq.s32.totalorder %v3334_v10, %v3153_v54 }
 0x13e   :  { %2287 = vmatpush1.msk.msra.mxu1 %vm4590_vm7, %v4556_v32  ;;  %1035 = vmatprep.mubr.f32.mxu1 %v4554_v0  ;;  %vm4600_vm7 = vcmp.eq.s32.totalorder %v3334_v10, %v3160_v57 }
 0x13f   :  { %2288 = vmatprep.subr.msk.mxu1 %vm4591_vm8, %v4556_v32  ;;  %vm4601_vm8 = vcmp.eq.s32.totalorder %v3351_v12, %v3153_v54  ;;  %v3656_v54 = vpop.permute.xlu1 %407 }
 0x140   :  { %2289 = vmatpush1.msk.msra.mxu1 %vm4592_vm9, %v4556_v32  ;;  %vm4602_vm9 = vcmp.eq.s32.totalorder %v3351_v12, %v3160_v57  ;;  %v3670_v57 = vpop.permute.xlu0 %428  ;;  %v1288_v12 = vmul.f32 %v3831_v9, %v3831_v9 }
 0x141   :  { %2290 = vmatprep.subr.msk.mxu1 %vm4593_vm10, %v4556_v32  ;;  %vm477_vm10 = vcmp.eq.s32.totalorder %v3102_v19, %v3436_v20 }
 0x142   :  { %2291 = vmatpush1.msk.msra.mxu1 %vm4594_vm11, %v4556_v32  ;;  %vm478_vm11 = vcmp.eq.s32.totalorder %v3102_v19, %v3656_v54 }
 0x143   :  { %2292 = vmatprep.subr.msk.mxu1 %vm4595_vm12, %v4556_v32  ;;  %vm4580_vm12 = vcmp.eq.s32.totalorder %v3102_v19, %v3464_v23  ;;  %v3690_v50 = vpop.permute.xlu1 %437 }
 0x144   :  { %2293 = vmatpush1.msk.msra.mxu1 %vm4596_vm13, %v4556_v32  ;;  %vm4581_vm13 = vcmp.eq.s32.totalorder %v3102_v19, %v3495_v25  ;;  %v3710_v48 = vpop.permute.xlu0 %425 }
 0x145   :  { %2294 = vmatprep.subr.msk.mxu1 %vm4597_vm4, %v4556_v32  ;;  %vm4539_vm4 = vcmp.eq.s32.totalorder %v3102_v19, %v3526_v27 }
 0x146   :  { %2295 = vmatpush1.msk.msra.mxu1 %vm4598_vm5, %v4556_v32  ;;  %vm4538_vm5 = vcmp.eq.s32.totalorder %v3102_v19, %v3552_v29 }
 0x147   :  { %2296 = vmatprep.subr.msk.mxu1 %vm4599_vm6, %v4556_v32  ;;  %vm4540_vm6 = vcmp.eq.s32.totalorder %v3102_v19, %v3578_v30  ;;  %v3716_v46 = vpop.permute.xlu1 %383 }
 0x148   :  { %2297 = vmatpush1.msk.msra.mxu1 %vm4600_vm7, %v4556_v32  ;;  %vm4541_vm7 = vcmp.eq.s32.totalorder %v3102_v19, %v3604_v31  ;;  %v3750_v43 = vpop.permute.xlu0 %422 }
 0x149   :  { %2298 = vmatprep.subr.msk.mxu1 %vm4601_vm8, %v4556_v32  ;;  %vm4542_vm8 = vcmp.eq.s32.totalorder %v3102_v19, %v3606_v33  ;;  %4603 = vst [vmem:[#allocation14_spill] sm:$0xff] %v3750_v43 }
 0x14a   :  { %2299 = vmatpush1.msk.msra.mxu1 %vm4602_vm9, %v4556_v32  ;;  %vm4544_vm9 = vcmp.eq.s32.totalorder %v3102_v19, %v3608_v34 }
 0x14b   :  { %2300 = vmatprep.subr.msk.mxu1 %vm245_vm15, %v4556_v32  ;;  %vm479_vm15 = vcmp.eq.s32.totalorder %v3102_v19, %v3640_v44  ;;  %v3744_v60 = vpop.permute.xlu1 %380 }
 0x14c   :  { %2301 = vmatpush1.msk.msra.mxu1 %vm244_vm0, %v4556_v32  ;;  %vm493_vm0 = vcmp.eq.s32.totalorder %v3102_v19, %v3395_v17  ;;  %v3788_v61 = vpop.permute.xlu0 %419 }
 0x14d   :  { %2302 = vmatprep.subr.msk.mxu1 %vm243_vm3, %v4556_v32  ;;  %vm480_vm3 = vcmp.eq.s32.totalorder %v3102_v19, %v3624_v38  ;;  %4605 = vst [vmem:[#allocation16_spill] sm:$0xff] %v3788_v61 }
 0x14e   :  { %2303 = vmatpush1.msk.msra.mxu1 %vm242_vm2, %v4556_v32  ;;  %vm495_vm2 = vcmp.eq.s32.totalorder %v3102_v19, %v3289_v5 }
 0x14f   :  { %2304 = vmatprep.subr.msk.mxu1 %vm241_vm1, %v4556_v32  ;;  %vm496_vm1 = vcmp.eq.s32.totalorder %v3102_v19, %v3612_v37  ;;  %v3770_v45 = vpop.permute.xlu1 %377 }
 0x150   :  { %2305 = vmatpush1.msk.msra.mxu1 %vm240_vm14, %v4556_v32  ;;  %2384 = vmatprep.subr.msk.mxu0 %vm496_vm1, %v4556_v32  ;;  %vm494_vm14 = vcmp.eq.s32.totalorder %v3102_v19, %v3342_v11  ;;  %4604 = vst [vmem:[#allocation15_spill] sm:$0xff] %v3770_v45 }
 0x151   :  { %2385 = vmatpush3.msk.msra.mxu0 %vm480_vm3, %v4556_v32 }
 0x152   :  { %2386 = vmatprep.subr.msk.mxu0 %vm495_vm2, %v4556_v32 }
 0x153   :  { %2387 = vmatpush3.msk.msra.mxu0 %vm479_vm15, %v4556_v32  ;;  %v3798_v62 = vpop.permute.xlu1 %374 }
 0x154   :  { %2388 = vmatprep.subr.msk.mxu0 %vm494_vm14, %v4556_v32  ;;  %4606 = vst [vmem:[#allocation17_spill] sm:$0xff] %v3798_v62 }
 0x155   :  { %2389 = vmatpush3.msk.msra.mxu0 %vm478_vm11, %v4556_v32 }
 0x156   :  { %2390 = vmatprep.subr.msk.mxu0 %vm493_vm0, %v4556_v32 }
 0x157   :  { %2391 = vmatpush3.msk.msra.mxu0 %vm477_vm10, %v4556_v32 }
 0x158   :  { %2392 = vmatprep.subr.msk.mxu0 %vm4580_vm12, %v4556_v32 }
 0x159   :  { %2393 = vmatpush3.msk.msra.mxu0 %vm4581_vm13, %v4556_v32 }
 0x15a   :  { %2394 = vmatprep.subr.msk.mxu0 %vm4539_vm4, %v4556_v32  ;;  %vm487_vm4 = vcmp.eq.s32.totalorder %v3102_v19, %v3614_v39 }
 0x15b   :  { %2395 = vmatpush3.msk.msra.mxu0 %vm4538_vm5, %v4556_v32  ;;  %vm4545_vm5 = vcmp.eq.s32.totalorder %v3102_v19, %v3610_v36 }
 0x15c   :  { %2396 = vmatprep.subr.msk.mxu0 %vm4540_vm6, %v4556_v32  ;;  %vm4543_vm6 = vcmp.eq.s32.totalorder %v3102_v19, %v3690_v50 }
 0x15d   :  { %2397 = vmatpush3.msk.msra.mxu0 %vm4541_vm7, %v4556_v32  ;;  %vm4546_vm7 = vcmp.eq.s32.totalorder %v3102_v19, %v3632_v40 }
 0x15e   :  { %2398 = vmatprep.subr.msk.mxu0 %vm4542_vm8, %v4556_v32  ;;  %vm4547_vm8 = vcmp.eq.s32.totalorder %v3102_v19, %v3642_v53 }
 0x15f   :  { %2399 = vmatpush3.msk.msra.mxu0 %vm4544_vm9, %v4556_v32  ;;  %vm4548_vm9 = vcmp.eq.s32.totalorder %v3102_v19, %v3716_v46 }
 0x160   :  { %2400 = vmatprep.subr.msk.mxu0 %vm4543_vm6, %v4556_v32  ;;  %vm4549_vm6 = vcmp.eq.s32.totalorder %v3102_v19, %v3670_v57 }
 0x161   :  { %2401 = vmatpush3.msk.msra.mxu0 %vm4545_vm5, %v4556_v32  ;;  %vm484_vm5 = vcmp.eq.s32.totalorder %v3102_v19, %v3710_v48 }
 0x162   :  { %2402 = vmatprep.subr.msk.mxu0 %vm487_vm4, %v4556_v32 }
 0x163   :  { %2403 = vmatpush3.msk.msra.mxu0 %vm4546_vm7, %v4556_v32  ;;  %vm4550_vm7 = vcmp.eq.s32.totalorder %v3102_v19, %v3744_v60 }
 0x164   :  { %2404 = vmatprep.subr.msk.mxu0 %vm4547_vm8, %v4556_v32  ;;  %vm483_vm8 = vcmp.eq.s32.totalorder %v3102_v19, %v3750_v43 }
 0x165   :  { %2405 = vmatpush3.msk.msra.mxu0 %vm4548_vm9, %v4556_v32  ;;  %vm4551_vm9 = vcmp.eq.s32.totalorder %v3102_v19, %v3770_v45 }
 0x166   :  { %2406 = vmatprep.subr.msk.mxu0 %vm4549_vm6, %v4556_v32  ;;  %vm4552_vm6 = vcmp.eq.s32.totalorder %v3102_v19, %v3788_v61 }
 0x167   :  { %2407 = vmatpush3.msk.msra.mxu0 %vm4550_vm7, %v4556_v32  ;;  %vm4553_vm7 = vcmp.eq.s32.totalorder %v3102_v19, %v3798_v62 }
 0x168   :  { %2408 = vmatprep.subr.msk.mxu0 %vm484_vm5, %v4556_v32 }
 0x169   :  { %2409 = vmatpush3.msk.msra.mxu0 %vm4551_vm9, %v4556_v32  ;;  %vm637_vm9 = vcmask 1041408  }
 0x16a   :  { %2410 = vmatprep.subr.msk.mxu0 %vm483_vm8, %v4556_v32 }
 0x16b   :  { %2411 = vmatpush3.msk.msra.mxu0 %vm4553_vm7, %v4556_v32 }
 0x16c   :  { %2412 = vmatprep.subr.msk.mxu0 %vm4552_vm6, %v4556_v32 }
 0x1d1   :  { %v632_v63 = vpop.f32.mrf.mxu1 }
 0x1d2   :  { %v638_v2 = vsel %vm637_vm9, %v632_v63, -inf }
 0x1d3   :  { %v634_v1 = vpop.f32.mrf.mxu1 }
 0x1d4   :  { %v639_v3 = vsel %vm637_vm9, %v634_v1, -inf  ;;  %vm4609_vm9 = vcmask 785408  }
 0x1d5   :  { %v640_v4 = vmax.f32 %v638_v2, %v639_v3  ;;  %v1296_v10 = vsel %vm4609_vm9, %v1285_v8, 0.0  ;;  %vm4611_vm6 = vmmov %vm4609_vm9  ;;  %v1729_v2 = vld [vmem:[%s4517_s9 + $0x10] sm:$0xff]  ;;  %v1730_v3 = vld [vmem:[%s4517_s9 + $0x18] sm:$0xff]  ;;  %vm4616_vm9 = vcmp.eq.s32.totalorder %v3102_v19, %v3117_v35 }
 0x1d6   :  { %v1305_v14 = vsel %vm4611_vm6, %v1288_v12, 0.0  ;;  %vm4612_vm7 = vmmov %vm4611_vm6 }
 0x1d7   :  { %641 = vmax.xlane.f32.xlu1 %v640_v4  ;;  %v1311_v16 = vsel %vm4612_vm7, %v1290_v15, 0.0  ;;  %vm4615_vm7 = vcmp.eq.s32.totalorder %v3102_v19, %v3108_v28 }
 0x1e8   :  { %371 = vperm.xlu1 %2715, %v338_v6   ;;  %v1732_v6 = vld [vmem:[%s4517_s9 + $0x28] sm:$0xff] }
 0x1f1   :  { %v3854_v4 = vpop.f32.mrf.mxu1 }
 0x1f3   :  { %v789_v8 = vpop.f32.mrf.mxu1 }
 0x1f4   :  { %v811_v0 = vmul.f32 %v789_v8, %v3171_v58 }
 0x1f5   :  { %v3862_v12 = vpop.f32.mrf.mxu1 }
 0x1f7   :  { %v3867_v15 = vpop.f32.mrf.mxu1 }
 0x1f8   :  { %4613 = vst [vmem:[#allocation21_spill] sm:$0xff] %v3867_v15 }
 0x20c   :  { %1297 = vadd.xlane.f32.xlu1 %v1296_v10  ;;  %v1734_v10 = vld [vmem:[%s4517_s9 + $0x38] sm:$0xff] }
 0x210   :  { %1306 = vadd.xlane.f32.xlu1 %v1305_v14  ;;  %v1736_v14 = vld [vmem:[%s4517_s9 + $0x48] sm:$0xff] }
 0x214   :  { %1312 = vadd.xlane.f32.xlu1 %v1311_v16  ;;  %v1738_v16 = vld [vmem:[%s4517_s9 + $0x58] sm:$0xff] }
 0x225   :  { %1741 = vperm.xlu1 %2715, %v1727_v18   ;;  %v3872_v18 = vpop.f32.mrf.mxu1 }
 0x229   :  { %1751 = vperm.xlu1 %2715, %v1729_v2   ;;  %v3874_v2 = vpop.f32.mrf.mxu1 }
 0x22d   :  { %1756 = vperm.xlu1 %2715, %v1730_v3   ;;  %v3876_v3 = vpop.f32.mrf.mxu1 }
 0x231   :  { %1766 = vperm.xlu1 %2715, %v1732_v6   ;;  %v813_v6 = vmul.f32 %v3867_v15, %v3157_v56 }
 0x233   :  { %v827_v32 = vadd.f32 %v813_v6, %v811_v0  ;;  %v812_v0 = vmul.f32 %v3862_v12, %v3164_v55 }
 0x235   :  { %1776 = vperm.xlu1 %2715, %v1734_v10   ;;  %v3880_v10 = vpop.f32.mrf.mxu1 }
 0x236   :  { %v817_v13 = vmul.f32 %v3880_v10, %v3131_v42 }
 0x239   :  { %1786 = vperm.xlu1 %2715, %v1736_v14   ;;  %v815_v14 = vmul.f32 %v3874_v2, %v3143_v51 }
 0x23b   :  { %v828_v9 = vadd.f32 %v827_v32, %v815_v14  ;;  %v4614_v32 = vmov 1.0  }
 0x23d   :  { %1796 = vperm.xlu1 %2715, %v1738_v16   ;;  %v829_v16 = vadd.f32 %v828_v9, %v817_v13 }
 0x23f   :  { %v830_v7 = vrot.slane %v829_v16, 4 }
 0x241   :  { %v831_v26 = vadd.f32 %v830_v7, %v829_v16 }
 0x243   :  { %v832_v24 = vrot.slane %v831_v26, 2 }
 0x245   :  { %v833_v22 = vadd.f32 %v832_v24, %v831_v26 }
 0x247   :  { %v834_v43 = vrot.slane %v833_v22, 1 }
 0x249   :  { %v835_v24 = vadd.f32 %v834_v43, %v833_v22 }
 0x260   :  { %v642_v21 = vpop.xlane.xlu1 %641 }
 0x261   :  { %v643_v41 = vsub.f32 %v632_v63, %v642_v21  ;;  %v644_v61 = vsub.f32 %v634_v1, %v642_v21  ;;  %v814_v21 = vmul.f32 %v3872_v18, %v3147_v52  ;;  %v837_v63 = vmul.f32 2.0, %v835_v24 }
 0x263   :  { %v645_v15 = vmul.f32 1.442695, %v643_v41  ;;  %v647_v62 = vmul.f32 1.442695, %v644_v61  ;;  %v810_v41 = vmul.f32 %v3854_v4, %v3178_v59  ;;  %v816_v61 = vmul.f32 %v3876_v3, %v3139_v49 }
 0x264   :  { %v3887_v45 = vpop.permute.xlu1 %371  ;;  %v839_v7 = vmul.f32 %v837_v63, %v3171_v58 }
 0x265   :  { %2728 = vpow2.f32 %v645_v15  ;;  %vm466_vm6 = vcmp.eq.s32.totalorder %v3102_v19, %v3887_v45  ;;  %v818_v26 = vadd.f32 %v812_v0, %v810_v41 }
 0x266   :  { %2730 = vpow2.f32 %v647_v62  ;;  %2413 = vmatpush3.msk.msra.mxu0 %vm466_vm6, %v4614_v32  ;;  %v847_v6 = vsub.f32 %v789_v8, %v839_v7 }
 0x267   :  { %2417 = vmatprep.subr.msk.mxu0 %vm4615_vm7, %v4614_v32  ;;  %v819_v62 = vadd.f32 %v818_v26, %v814_v21  ;;  %vm4617_vm7 = vcmp.eq.s32.totalorder %v3102_v19, %v3526_v27  ;;  %v841_v26 = vmul.f32 %v837_v63, %v3157_v56 }
 0x269   :  { %v820_v1 = vadd.f32 %v819_v62, %v816_v61  ;;  %v4630_v62 = vld [vmem:[#allocation15_spill] sm:$0xff] }
 0x26b   :  { %v821_v9 = vrot.slane %v820_v1, 4 }
 0x26d   :  { %v822_v43 = vadd.f32 %v821_v9, %v820_v1 }
 0x26f   :  { %v823_v8 = vrot.slane %v822_v43, 2 }
 0x271   :  { %v824_v16 = vadd.f32 %v823_v8, %v822_v43  ;;  %v4635_v43 = vld [vmem:[#allocation21_spill] sm:$0xff]  ;;  %v843_v8 = vmul.f32 %v837_v63, %v3143_v51 }
 0x272   :  { %v3908_v13 = vpop.eup %2728 }
 0x273   :  { %v3910_v15 = vpop.eup %2730  ;;  %v825_v0 = vrot.slane %v824_v16, 1  ;;  %v857_v61 = vrot.slane %v3908_v13, %v3137_v47 }
 0x274   :  { %713 = vmatprep.mubr.f32.mxu0 %v3910_v15  ;;  %v3915_v22 = vrot.slane %v3910_v15, %v3137_v47 }
 0x275   :  { %714 = vmatmul.mubr.f32.vlgmr.msra.gmra.mxu0 %v3908_v13  ;;  %v826_v41 = vadd.f32 %v825_v0, %v824_v16  ;;  %v4636_v16 = vld [vmem:[#allocation16_spill] sm:$0xff] }
 0x276   :  { %2418 = vmatpush3.msk.msra.mxu0 %vm4616_vm9, %v4614_v32  ;;  %v863_v14 = vmul.f32 %v3915_v22, %v847_v6  ;;  %vm4618_vm9 = vcmp.eq.s32.totalorder %v3102_v19, %v3552_v29  ;;  %v4633_v6 = vld [vmem:[#allocation17_spill] sm:$0xff] }
 0x277   :  { %2419 = vmatprep.subr.msk.mxu0 %vm496_vm1, %v4614_v32  ;;  %v836_v21 = vmul.f32 2.0, %v826_v41 }
 0x278   :  { %2420 = vmatpush3.msk.msra.mxu0 %vm480_vm3, %v4614_v32  ;;  %934 = vmatprep.mubr.f32.mxu0 %v863_v14  ;;  %v849_v14 = vsub.f32 %v4635_v43, %v841_v26  ;;  %v845_v26 = vmul.f32 %v837_v63, %v3131_v42 }
 0x279   :  { %2421 = vmatprep.subr.msk.mxu0 %vm495_vm2, %v4614_v32  ;;  %v838_v24 = vmul.f32 %v836_v21, %v3178_v59  ;;  %v840_v9 = vmul.f32 %v836_v21, %v3164_v55  ;;  %v844_v63 = vmul.f32 %v836_v21, %v3139_v49 }
 0x27a   :  { %2422 = vmatpush3.msk.msra.mxu0 %vm479_vm15, %v4614_v32  ;;  %v853_v37 = vsub.f32 %v3880_v10, %v845_v26 }
 0x27b   :  { %2423 = vmatprep.subr.msk.mxu0 %vm494_vm14, %v4614_v32  ;;  %v846_v7 = vsub.f32 %v3854_v4, %v838_v24  ;;  %v865_v4 = vmul.f32 %v3915_v22, %v849_v14  ;;  %v848_v41 = vsub.f32 %v3862_v12, %v840_v9  ;;  %v842_v24 = vmul.f32 %v836_v21, %v3147_v52 }
 0x27c   :  { %2424 = vmatpush3.msk.msra.mxu0 %vm478_vm11, %v4614_v32  ;;  %v869_v5 = vmul.f32 %v3915_v22, %v853_v37 }
 0x27d   :  { %2425 = vmatprep.subr.msk.mxu0 %vm493_vm0, %v4614_v32  ;;  %v862_v0 = vmul.f32 %v857_v61, %v846_v7  ;;  %v851_v7 = vsub.f32 %v3874_v2, %v843_v8 }
 0x27e   :  { %2426 = vmatpush3.msk.msra.mxu0 %vm477_vm10, %v4614_v32 }
 0x27f   :  { %2427 = vmatprep.subr.msk.mxu0 %vm4580_vm12, %v4614_v32  ;;  %vm4619_vm12 = vcmp.eq.s32.totalorder %v3102_v19, %v3578_v30  ;;  %v867_v12 = vmul.f32 %v3915_v22, %v851_v7 }
 0x280   :  { %2428 = vmatpush3.msk.msra.mxu0 %vm4581_vm13, %v4614_v32  ;;  %vm4620_vm13 = vcmp.eq.s32.totalorder %v3102_v19, %v3604_v31 }
 0x281   :  { %2429 = vmatprep.subr.msk.mxu0 %vm4617_vm7, %v4614_v32  ;;  %vm4621_vm7 = vcmp.eq.s32.totalorder %v3102_v19, %v3606_v33 }
 0x282   :  { %2430 = vmatpush3.msk.msra.mxu0 %vm4618_vm9, %v4614_v32  ;;  %vm4622_vm9 = vcmp.eq.s32.totalorder %v3102_v19, %v3608_v34 }
 0x283   :  { %2431 = vmatprep.subr.msk.mxu0 %vm4619_vm12, %v4614_v32  ;;  %vm4623_vm12 = vcmp.eq.s32.totalorder %v3102_v19, %v3690_v50 }
 0x284   :  { %2432 = vmatpush3.msk.msra.mxu0 %vm4620_vm13, %v4614_v32  ;;  %vm4624_vm13 = vcmp.eq.s32.totalorder %v3102_v19, %v3610_v36 }
 0x285   :  { %2433 = vmatprep.subr.msk.mxu0 %vm4621_vm7, %v4614_v32  ;;  %vm4625_vm7 = vcmp.eq.s32.totalorder %v3102_v19, %v3632_v40 }
 0x286   :  { %2434 = vmatpush3.msk.msra.mxu0 %vm4622_vm9, %v4614_v32  ;;  %vm4626_vm9 = vcmp.eq.s32.totalorder %v3102_v19, %v3642_v53 }
 0x287   :  { %2435 = vmatprep.subr.msk.mxu0 %vm4623_vm12, %v4614_v32  ;;  %vm4627_vm12 = vcmp.eq.s32.totalorder %v3102_v19, %v3716_v46 }
 0x288   :  { %2436 = vmatpush3.msk.msra.mxu0 %vm4624_vm13, %v4614_v32  ;;  %vm4628_vm13 = vcmp.eq.s32.totalorder %v3102_v19, %v3670_v57 }
 0x289   :  { %2437 = vmatprep.subr.msk.mxu0 %vm487_vm4, %v4614_v32 }
 0x28a   :  { %2438 = vmatpush3.msk.msra.mxu0 %vm4625_vm7, %v4614_v32  ;;  %vm4629_vm7 = vcmp.eq.s32.totalorder %v3102_v19, %v3744_v60 }
 0x28b   :  { %2439 = vmatprep.subr.msk.mxu0 %vm4626_vm9, %v4614_v32  ;;  %vm4631_vm9 = vcmp.eq.s32.totalorder %v3102_v19, %v4630_v62 }
 0x28c   :  { %2440 = vmatpush3.msk.msra.mxu0 %vm4627_vm12, %v4614_v32  ;;  %vm4634_vm12 = vcmp.eq.s32.totalorder %v3102_v19, %v4633_v6 }
 0x28d   :  { %2441 = vmatprep.subr.msk.mxu0 %vm4628_vm13, %v4614_v32  ;;  %vm4637_vm13 = vcmp.eq.s32.totalorder %v3102_v19, %v4636_v16 }
 0x28e   :  { %2442 = vmatpush3.msk.msra.mxu0 %vm4629_vm7, %v4614_v32  ;;  %vm4638_vm7 = vcmp.eq.s32.totalorder %v3102_v19, %v3108_v28  ;;  %v864_v28 = vmul.f32 %v857_v61, %v848_v41 }
 0x28f   :  { %2443 = vmatprep.subr.msk.mxu0 %vm484_vm5, %v4614_v32 }
 0x290   :  { %2444 = vmatpush3.msk.msra.mxu0 %vm4631_vm9, %v4614_v32  ;;  %vm4639_vm9 = vcmp.eq.s32.totalorder %v3102_v19, %v3117_v35  ;;  %v850_v35 = vsub.f32 %v3872_v18, %v842_v24  ;;  %v852_v18 = vsub.f32 %v3876_v3, %v844_v63 }
 0x291   :  { %2445 = vmatprep.subr.msk.mxu0 %vm483_vm8, %v4614_v32 }
 0x292   :  { %2446 = vmatpush3.msk.msra.mxu0 %vm4634_vm12, %v4614_v32  ;;  %v866_v38 = vmul.f32 %v857_v61, %v850_v35  ;;  %v868_v11 = vmul.f32 %v857_v61, %v852_v18  ;;  %vm4648_vm12 = vcmp.eq.s32.totalorder %v3102_v19, %v3690_v50 }
 0x293   :  { %2447 = vmatprep.subr.msk.mxu0 %vm4637_vm13, %v4614_v32  ;;  %vm4649_vm13 = vcmp.eq.s32.totalorder %v3102_v19, %v3610_v36 }
 0x294   :  { %2448 = vmatpush3.msk.msra.mxu0 %vm466_vm6, %v4614_v32 }
 0x295   :  { %935 = vmatmul.mubr.f32.vlgmr.msra.gmra.mxu0 %v862_v0  ;;  %2461 = vmatprep.subr.msk.mxu0 %vm4638_vm7, %v4614_v32  ;;  %vm4650_vm7 = vcmp.eq.s32.totalorder %v3102_v19, %v3632_v40 }
 0x296   :  { %939 = vmatprep.mubr.f32.mxu0 %v865_v4  ;;  %2462 = vmatpush3.msk.msra.mxu0 %vm4639_vm9, %v4614_v32  ;;  %vm4651_vm9 = vcmp.eq.s32.totalorder %v3102_v19, %v3642_v53 }
 0x297   :  { %2463 = vmatprep.subr.msk.mxu0 %vm496_vm1, %v4614_v32  ;;  %vm4640_vm1 = vcmp.eq.s32.totalorder %v3102_v19, %v3464_v23 }
 0x298   :  { %2464 = vmatpush3.msk.msra.mxu0 %vm480_vm3, %v4614_v32  ;;  %vm4642_vm3 = vcmp.eq.s32.totalorder %v3102_v19, %v3526_v27 }
 0x299   :  { %940 = vmatmul.mubr.f32.gmra.mxu0 %v864_v28  ;;  %2465 = vmatprep.subr.msk.mxu0 %vm495_vm2, %v4614_v32  ;;  %vm4641_vm2 = vcmp.eq.s32.totalorder %v3102_v19, %v3495_v25 }
 0x29a   :  { %944 = vmatprep.mubr.f32.mxu0 %v867_v12  ;;  %2466 = vmatpush3.msk.msra.mxu0 %vm479_vm15, %v4614_v32  ;;  %vm4644_vm15 = vcmp.eq.s32.totalorder %v3102_v19, %v3578_v30 }
 0x29b   :  { %2467 = vmatprep.subr.msk.mxu0 %vm494_vm14, %v4614_v32  ;;  %vm4643_vm14 = vcmp.eq.s32.totalorder %v3102_v19, %v3552_v29 }
 0x29c   :  { %2468 = vmatpush3.msk.msra.mxu0 %vm478_vm11, %v4614_v32  ;;  %vm4647_vm11 = vcmp.eq.s32.totalorder %v3102_v19, %v3608_v34 }
 0x29d   :  { %945 = vmatmul.mubr.f32.gmra.mxu0 %v866_v38  ;;  %2469 = vmatprep.subr.msk.mxu0 %vm493_vm0, %v4614_v32  ;;  %vm4645_vm0 = vcmp.eq.s32.totalorder %v3102_v19, %v3604_v31 }
 0x29e   :  { %949 = vmatprep.mubr.f32.mxu0 %v869_v5  ;;  %2470 = vmatpush3.msk.msra.mxu0 %vm477_vm10, %v4614_v32  ;;  %vm4646_vm10 = vcmp.eq.s32.totalorder %v3102_v19, %v3606_v33 }
 0x29f   :  { %2471 = vmatprep.subr.msk.mxu0 %vm4640_vm1, %v4614_v32  ;;  %vm4652_vm1 = vcmp.eq.s32.totalorder %v3102_v19, %v3716_v46 }
 0x2a0   :  { %2472 = vmatpush3.msk.msra.mxu0 %vm4641_vm2, %v4614_v32  ;;  %vm4653_vm2 = vcmp.eq.s32.totalorder %v3102_v19, %v3670_v57 }
 0x2a1   :  { %950 = vmatmul.mubr.f32.gmra.mxu0 %v868_v11  ;;  %2473 = vmatprep.subr.msk.mxu0 %vm4642_vm3, %v4614_v32  ;;  %vm4655_vm3 = vcmp.eq.s32.totalorder %v3102_v19, %v4630_v62 }
 0x2a2   :  { %2474 = vmatpush3.msk.msra.mxu0 %vm4643_vm14, %v4614_v32  ;;  %vm4656_vm14 = vcmp.eq.s32.totalorder %v3102_v19, %v4633_v6 }
 0x2a3   :  { %2475 = vmatprep.subr.msk.mxu0 %vm4644_vm15, %v4614_v32  ;;  %vm4657_vm15 = vcmp.eq.s32.totalorder %v3102_v19, %v4636_v16 }
 0x2a4   :  { %2476 = vmatpush3.msk.msra.mxu0 %vm4645_vm0, %v4614_v32 }
 0x2a5   :  { %2477 = vmatprep.subr.msk.mxu0 %vm4646_vm10, %v4614_v32 }
 0x2a6   :  { %2478 = vmatpush3.msk.msra.mxu0 %vm4647_vm11, %v4614_v32 }
 0x2a7   :  { %2479 = vmatprep.subr.msk.mxu0 %vm4648_vm12, %v4614_v32 }
 0x2a8   :  { %2480 = vmatpush3.msk.msra.mxu0 %vm4649_vm13, %v4614_v32 }
 0x2a9   :  { %2481 = vmatprep.subr.msk.mxu0 %vm487_vm4, %v4614_v32  ;;  %vm4654_vm4 = vcmp.eq.s32.totalorder %v3102_v19, %v3744_v60 }
 0x2aa   :  { %2482 = vmatpush3.msk.msra.mxu0 %vm4650_vm7, %v4614_v32  ;;  %vm1541_vm7 = vcmask 523264  }
 0x2ab   :  { %2483 = vmatprep.subr.msk.mxu0 %vm4651_vm9, %v4614_v32 }
 0x2ac   :  { %2484 = vmatpush3.msk.msra.mxu0 %vm4652_vm1, %v4614_v32 }
 0x2ad   :  { %2485 = vmatprep.subr.msk.mxu0 %vm4653_vm2, %v4614_v32 }
 0x2ae   :  { %2486 = vmatpush3.msk.msra.mxu0 %vm4654_vm4, %v4614_v32 }
 0x2af   :  { %2487 = vmatprep.subr.msk.mxu0 %vm484_vm5, %v4614_v32  ;;  %vm4660_vm5 = vcmask 785408  }
 0x2b0   :  { %2488 = vmatpush3.msk.msra.mxu0 %vm4655_vm3, %v4614_v32  ;;  %vm4669_vm0 = vmmov %vm4660_vm5 }
 0x2b1   :  { %2489 = vmatprep.subr.msk.mxu0 %vm483_vm8, %v4614_v32  ;;  %vm4666_vm8 = vmmov %vm4660_vm5 }
 0x2b2   :  { %2490 = vmatpush3.msk.msra.mxu0 %vm4656_vm14, %v4614_v32  ;;  %vm4670_vm10 = vmmov %vm4669_vm0 }
 0x2b3   :  { %2491 = vmatprep.subr.msk.mxu0 %vm4657_vm15, %v4614_v32  ;;  %vm4672_vm11 = vmmov %vm4669_vm0 }
 0x2b4   :  { %2492 = vmatpush3.msk.msra.mxu0 %vm466_vm6, %v4614_v32  ;;  %vm4667_vm6 = vmmov %vm4660_vm5 }
 0x2b5   :  { %vm4673_vm12 = vmmov %vm4669_vm0 }
 0x2b6   :  { %vm4674_vm13 = vmmov %vm4669_vm0 }
 0x2b7   :  { %vm4675_vm9 = vmmov %vm4669_vm0 }
 0x2b8   :  { %vm4676_vm1 = vmmov %vm4669_vm0 }
 0x2b9   :  { %vm4677_vm2 = vmmov %vm4669_vm0 }
 0x2ba   :  { %vm4678_vm4 = vmmov %vm4669_vm0 }
 0x2bb   :  { %vm4679_vm3 = vmmov %vm4669_vm0 }
 0x2bc   :  { %vm4680_vm14 = vmmov %vm4669_vm0 }
 0x2bd   :  { %vm4681_vm15 = vmmov %vm4669_vm0 }
 0x335   :  { %v2414_v17 = vpop.f32.mrf.mxu0 }
 0x337   :  { %v2415_v20 = vpop.f32.mrf.mxu0 }
 0x338   :  { %v2416_v23 = vadd.f32 %v2415_v20, %v2414_v17 }
 0x33a   :  { %v719_v25 = vmax.f32 %v2416_v23, 1e-30 }
 0x33c   :  { %2732 = vrcp.f32 %v719_v25 }
 0x349   :  { %v4190_v27 = vpop.eup %2732 }
 0x34a   :  { %v958_v33 = vrot.slane %v4190_v27, %v3137_v47  ;;  %v4658_v47 = vmov 0.0  }
 0x355   :  { %v2449_v29 = vpop.f32.mrf.mxu0 }
 0x357   :  { %v2450_v30 = vpop.f32.mrf.mxu0 }
 0x358   :  { %v2451_v31 = vadd.f32 %v2450_v30, %v2449_v29 }
 0x359   :  { %v2452_v34 = vpop.f32.mrf.mxu0 }
 0x35a   :  { %v959_v36 = vmul.f32 %v2451_v31, %v958_v33 }
 0x35b   :  { %v2453_v39 = vpop.f32.mrf.mxu0 }
 0x35c   :  { %2734 = vtanh.f32 %v959_v36  ;;  %v2454_v40 = vadd.f32 %v2453_v39, %v2452_v34 }
 0x35d   :  { %v2455_v19 = vpop.f32.mrf.mxu0 }
 0x35e   :  { %v960_v44 = vmul.f32 %v2454_v40, %v958_v33 }
 0x35f   :  { %v2456_v53 = vpop.f32.mrf.mxu0 }
 0x360   :  { %2736 = vtanh.f32 %v960_v44  ;;  %v2457_v54 = vadd.f32 %v2456_v53, %v2455_v19  ;;  %v4659_v53 = vld [vmem:[#allocation9_spill] sm:$0xff] }
 0x361   :  { %v2458_v57 = vpop.f32.mrf.mxu0 }
 0x362   :  { %v961_v50 = vmul.f32 %v2457_v54, %v958_v33  ;;  %v1111_v54 = vrot.slane %v3910_v15, %v4659_v53 }
 0x363   :  { %v2459_v48 = vpop.f32.mrf.mxu0 }
 0x364   :  { %2738 = vtanh.f32 %v961_v50  ;;  %v2460_v46 = vadd.f32 %v2459_v48, %v2458_v57  ;;  %v1107_v48 = vrot.slane %v3908_v13, %v4659_v53 }
 0x366   :  { %v962_v60 = vmul.f32 %v2460_v46, %v958_v33 }
 0x368   :  { %2740 = vtanh.f32 %v962_v60 }
 0x369   :  { %v4194_v45 = vpop.eup %2734 }
 0x36a   :  { %1036 = vmatmul.mubr.f32.vlgmr.msra.gmra.mxu1 %v4194_v45 }
 0x36b   :  { %1041 = vmatprep.mubr.f32.mxu1 %v4658_v47 }
 0x36d   :  { %v4198_v2 = vpop.eup %2736 }
 0x36e   :  { %1042 = vmatmul.mubr.f32.gmra.mxu1 %v4198_v2 }
 0x36f   :  { %1047 = vmatprep.mubr.f32.mxu1 %v4658_v47 }
 0x371   :  { %v4202_v3 = vpop.eup %2738 }
 0x372   :  { %1048 = vmatmul.mubr.f32.gmra.mxu1 %v4202_v3 }
 0x373   :  { %1053 = vmatprep.mubr.f32.mxu1 %v4658_v47 }
 0x375   :  { %v4206_v10 = vpop.eup %2740 }
 0x376   :  { %1054 = vmatmul.mubr.f32.gmra.mxu1 %v4206_v10 }
 0x42a   :  { %v1037_v32 = vpop.f32.mrf.mxu1 }
 0x42b   :  { %v1060_v9 = vmul.f32 %v1037_v32, %v3178_v59 }
 0x42c   :  { %v1039_v22 = vpop.f32.mrf.mxu1 }
 0x42d   :  { %v1061_v8 = vmul.f32 %v1039_v22, %v3171_v58 }
 0x42e   :  { %v1043_v21 = vpop.f32.mrf.mxu1 }
 0x42f   :  { %v1062_v62 = vmul.f32 %v1043_v21, %v3164_v55 }
 0x430   :  { %v1045_v61 = vpop.f32.mrf.mxu1 }
 0x431   :  { %v1063_v6 = vmul.f32 %v1045_v61, %v3157_v56  ;;  %v1068_v16 = vadd.f32 %v1062_v62, %v1060_v9 }
 0x432   :  { %v1049_v1 = vpop.f32.mrf.mxu1 }
 0x433   :  { %v1064_v43 = vmul.f32 %v1049_v1, %v3147_v52  ;;  %v1077_v41 = vadd.f32 %v1063_v6, %v1061_v8 }
 0x434   :  { %v1051_v14 = vpop.f32.mrf.mxu1 }
 0x435   :  { %v1065_v0 = vmul.f32 %v1051_v14, %v3143_v51  ;;  %v1069_v24 = vadd.f32 %v1068_v16, %v1064_v43 }
 0x436   :  { %v1055_v4 = vpop.f32.mrf.mxu1 }
 0x437   :  { %v1066_v26 = vmul.f32 %v1055_v4, %v3139_v49  ;;  %v1078_v28 = vadd.f32 %v1077_v41, %v1065_v0  ;;  %v1208_v0 = vrot.slane %v4190_v27, %v4659_v53  ;;  %v1240_v53 = vmul.f32 %v4206_v10, %v4206_v10 }
 0x438   :  { %v1057_v7 = vpop.f32.mrf.mxu1 }
 0x439   :  { %v1070_v12 = vadd.f32 %v1069_v24, %v1066_v26  ;;  %v1067_v63 = vmul.f32 %v1057_v7, %v3131_v42  ;;  %v4661_v24 = vld [vmem:[#allocation10_spill] sm:$0xff] }
 0x43a   :  { %v1233_v26 = vmul.f32 %v4661_v24, %v4661_v24 }
 0x43b   :  { %v1071_v35 = vrot.slane %v1070_v12, 4  ;;  %v1079_v37 = vadd.f32 %v1078_v28, %v1067_v63 }
 0x43d   :  { %v1072_v38 = vadd.f32 %v1071_v35, %v1070_v12  ;;  %v1080_v5 = vrot.slane %v1079_v37, 4 }
 0x43f   :  { %v1073_v18 = vrot.slane %v1072_v38, 2  ;;  %v1081_v11 = vadd.f32 %v1080_v5, %v1079_v37  ;;  %v4663_v37 = vld [vmem:[#allocation12_spill] sm:$0xff] }
 0x441   :  { %v1074_v17 = vadd.f32 %v1073_v18, %v1072_v38  ;;  %v1082_v20 = vrot.slane %v1081_v11, 2  ;;  %v1235_v38 = vmul.f32 %v4663_v37, %v4663_v37 }
 0x443   :  { %v1075_v23 = vrot.slane %v1074_v17, 1  ;;  %v1083_v25 = vadd.f32 %v1082_v20, %v1081_v11  ;;  %v4664_v20 = vld [vmem:[#allocation13_spill] sm:$0xff] }
 0x445   :  { %v1076_v29 = vadd.f32 %v1075_v23, %v1074_v17  ;;  %v1084_v30 = vrot.slane %v1083_v25, 1  ;;  %v1236_v23 = vmul.f32 %v4664_v20, %v4664_v20 }
 0x447   :  { %v1086_v31 = vmul.f32 2.0, %v1076_v29  ;;  %v1085_v33 = vadd.f32 %v1084_v30, %v1083_v25 }
 0x449   :  { %v1087_v34 = vmul.f32 2.0, %v1085_v33  ;;  %v1088_v36 = vmul.f32 %v1086_v31, %v3178_v59  ;;  %v1090_v44 = vmul.f32 %v1086_v31, %v3164_v55  ;;  %v1094_v15 = vmul.f32 %v1086_v31, %v3139_v49  ;;  %v2834_v49 = vld [vmem:[%s4514_s6] sm:$0xff] }
 0x44a   :  { %v1237_v33 = vmul.f32 %v4194_v45, %v4194_v45 }
 0x44b   :  { %v1089_v39 = vmul.f32 %v1087_v34, %v3171_v58  ;;  %v1096_v40 = vsub.f32 %v1037_v32, %v1088_v36  ;;  %v1091_v19 = vmul.f32 %v1087_v34, %v3157_v56  ;;  %v1093_v50 = vmul.f32 %v1087_v34, %v3143_v51 }
 0x44c   :  { %v1098_v59 = vsub.f32 %v1043_v21, %v1090_v44  ;;  %v1092_v58 = vmul.f32 %v1086_v31, %v3147_v52  ;;  %v1095_v32 = vmul.f32 %v1087_v34, %v3131_v42  ;;  %v1102_v13 = vsub.f32 %v1055_v4, %v1094_v15  ;;  %v1295_v42 = vpop.xlane.xlu0 %1294 }
 0x44d   :  { %v1097_v57 = vsub.f32 %v1039_v22, %v1089_v39  ;;  %v1099_v46 = vsub.f32 %v1045_v61, %v1091_v19  ;;  %v1112_v47 = vmul.f32 %v1107_v48, %v1096_v40  ;;  %v1101_v55 = vsub.f32 %v1051_v14, %v1093_v50 }
 0x44e   :  { %v1114_v22 = vmul.f32 %v1107_v48, %v1098_v59  ;;  %v1100_v51 = vsub.f32 %v1049_v1, %v1092_v58  ;;  %v1103_v62 = vsub.f32 %v1057_v7, %v1095_v32  ;;  %v1118_v52 = vmul.f32 %v1107_v48, %v1102_v13  ;;  %v4662_v7 = vld [vmem:[#allocation11_spill] sm:$0xff] }
 0x44f   :  { %v1113_v60 = vmul.f32 %v1111_v54, %v1097_v57  ;;  %v1115_v56 = vmul.f32 %v1111_v54, %v1099_v46  ;;  %v1117_v9 = vmul.f32 %v1111_v54, %v1101_v55  ;;  %v1317_v6 = vmax.f32 %v1295_v42, 1e-24 }
 0x450   :  { %v1116_v61 = vmul.f32 %v1107_v48, %v1100_v51  ;;  %v1119_v21 = vmul.f32 %v1111_v54, %v1103_v62  ;;  %v1234_v28 = vmul.f32 %v4662_v7, %v4662_v7  ;;  %v1238_v39 = vmul.f32 %v4198_v2, %v4198_v2  ;;  %v1301_v42 = vpop.xlane.xlu0 %1300 }
 0x451   :  { %1184 = vmatprep.mubr.f32.mxu0 %v1113_v60  ;;  %2742 = vrsqrt.f32 %v1317_v6  ;;  %v1239_v40 = vmul.f32 %v4202_v3, %v4202_v3  ;;  %v1298_v6 = vpop.xlane.xlu1 %1297 }
 0x452   :  { %1185 = vmatmul.mubr.f32.vlgmr.msra.gmra.mxu0 %v1112_v47  ;;  %v1245_v5 = vadd.f32 %v1234_v28, %v1233_v26 }
 0x453   :  { %1189 = vmatprep.mubr.f32.mxu0 %v1115_v56 }
 0x454   :  { %v1246_v25 = vadd.f32 %v1245_v5, %v1235_v38 }
 0x456   :  { %1190 = vmatmul.mubr.f32.gmra.mxu0 %v1114_v22  ;;  %v1247_v34 = vadd.f32 %v1246_v25, %v1236_v23 }
 0x457   :  { %1194 = vmatprep.mubr.f32.mxu0 %v1117_v9 }
 0x458   :  { %v1248_v19 = vadd.f32 %v1247_v34, %v1237_v33  ;;  %v4665_v34 = vld [vmem:[#allocation18_spill] sm:$0xff] }
 0x45a   :  { %1195 = vmatmul.mubr.f32.gmra.mxu0 %v1116_v61  ;;  %v1249_v54 = vadd.f32 %v1248_v19, %v1238_v39  ;;  %v2835_v19 = vld [vmem:[%s4514_s6 + $0x10] sm:$0xff] }
 0x45b   :  { %1199 = vmatprep.mubr.f32.mxu0 %v1119_v21 }
 0x45c   :  { %v1250_v48 = vadd.f32 %v1249_v54, %v1239_v40 }
 0x45e   :  { %1200 = vmatmul.mubr.f32.gmra.mxu0 %v1118_v52  ;;  %v2743_v43 = vpop.eup %2742  ;;  %v1251_v46 = vadd.f32 %v1250_v48, %v1240_v53 }
 0x45f   :  { %v1333_v1 = vmul.f32 %v2834_v49, %v2743_v43 }
 0x461   :  { %2593 = vmatprep.mubr.msk.f32.mxu1 %vm4660_vm5, %v1333_v1  ;;  %v1304_v1 = vpop.xlane.xlu0 %1303  ;;  %vm4682_vm5 = vmmov %vm4669_vm0 }
 0x465   :  { %v1310_v28 = vpop.xlane.xlu0 %1309 }
 0x512   :  { %v2493_v14 = vpop.f32.mrf.mxu0 }
 0x514   :  { %v2494_v8 = vpop.f32.mrf.mxu0 }
 0x515   :  { %v2495_v16 = vadd.f32 %v2494_v8, %v2493_v14  ;;  %v1318_v14 = vmax.f32 %v1298_v6, 1e-24 }
 0x516   :  { %v2496_v4 = vpop.f32.mrf.mxu0 }
 0x517   :  { %v1209_v41 = vmul.f32 %v2495_v16, %v1208_v0  ;;  %v1319_v16 = vmax.f32 %v1301_v42, 1e-24 }
 0x518   :  { %v2497_v12 = vpop.f32.mrf.mxu0 }
 0x519   :  { %v2498_v63 = vadd.f32 %v2497_v12, %v2496_v4  ;;  %2744 = vtanh.f32 %v1209_v41  ;;  %v1320_v41 = vmax.f32 %v1304_v1, 1e-24 }
 0x51a   :  { %v2499_v35 = vpop.f32.mrf.mxu0 }
 0x51b   :  { %v1210_v18 = vmul.f32 %v2498_v63, %v1208_v0 }
 0x51c   :  { %v2500_v11 = vpop.f32.mrf.mxu0 }
 0x51d   :  { %2746 = vtanh.f32 %v1210_v18  ;;  %v2501_v27 = vadd.f32 %v2500_v11, %v2499_v35  ;;  %v1322_v35 = vmax.f32 %v1310_v28, 1e-24 }
 0x51e   :  { %v2502_v17 = vpop.f32.mrf.mxu0 }
 0x51f   :  { %v1211_v29 = vmul.f32 %v2501_v27, %v1208_v0  ;;  %v1316_v27 = vpop.xlane.xlu0 %1315 }
 0x520   :  { %v2503_v30 = vpop.f32.mrf.mxu0 }
 0x521   :  { %2748 = vtanh.f32 %v1211_v29  ;;  %v2504_v31 = vadd.f32 %v2503_v30, %v2502_v17  ;;  %v1324_v17 = vmax.f32 %v1316_v27, 1e-24 }
 0x523   :  { %v1212_v36 = vmul.f32 %v2504_v31, %v1208_v0  ;;  %v1307_v0 = vpop.xlane.xlu1 %1306 }
 0x524   :  { %v1321_v12 = vmax.f32 %v1307_v0, 1e-24 }
 0x525   :  { %2750 = vtanh.f32 %v1212_v36 }
 0x526   :  { %v4249_v44 = vpop.eup %2744 }
 0x527   :  { %v1241_v50 = vmul.f32 %v4249_v44, %v4249_v44  ;;  %v1313_v38 = vpop.xlane.xlu1 %1312 }
 0x528   :  { %v1323_v18 = vmax.f32 %v1313_v38, 1e-24 }
 0x529   :  { %v1252_v59 = vadd.f32 %v1251_v46, %v1241_v50  ;;  %v2836_v50 = vld [vmem:[%s4514_s6 + $0x18] sm:$0xff] }
 0x52a   :  { %v4253_v57 = vpop.eup %2746 }
 0x52b   :  { %v1242_v60 = vmul.f32 %v4253_v57, %v4253_v57 }
 0x52d   :  { %v1253_v32 = vadd.f32 %v1252_v59, %v1242_v60  ;;  %v4668_v60 = vld [vmem:[#allocation19_spill] sm:$0xff] }
 0x52e   :  { %v4259_v47 = vpop.eup %2748 }
 0x52f   :  { %v1243_v58 = vmul.f32 %v4259_v47, %v4259_v47 }
 0x531   :  { %v1254_v55 = vadd.f32 %v1253_v32, %v1243_v58  ;;  %v2837_v32 = vld [vmem:[%s4514_s6 + $0x28] sm:$0xff] }
 0x532   :  { %v4263_v56 = vpop.eup %2750 }
 0x533   :  { %v1244_v15 = vmul.f32 %v4263_v56, %v4263_v56 }
 0x535   :  { %v1255_v22 = vadd.f32 %v1254_v55, %v1244_v15 }
 0x537   :  { %v1256_v51 = vrot.slane %v1255_v22, 4 }
 0x539   :  { %v1257_v62 = vadd.f32 %v1256_v51, %v1255_v22  ;;  %v4671_v22 = vld [vmem:[#allocation20_spill] sm:$0xff] }
 0x53b   :  { %v1258_v9 = vrot.slane %v1257_v62, 2 }
 0x53d   :  { %v1259_v13 = vadd.f32 %v1258_v9, %v1257_v62  ;;  %v2838_v62 = vld [vmem:[%s4514_s6 + $0x38] sm:$0xff] }
 0x53f   :  { %v1260_v61 = vrot.slane %v1259_v13, 1 }
 0x541   :  { %v1261_v21 = vadd.f32 %v1260_v61, %v1259_v13  ;;  %v1529_v13 = vld [vmem:[%s4515_s7] sm:$0xff] }
 0x543   :  { %v1262_v52 = vmax.f32 %v1261_v21, 1e-24 }
 0x545   :  { %2752 = vrsqrt.f32 %v1262_v52 }
 0x546   :  { %2754 = vrsqrt.f32 %v1318_v14 }
 0x547   :  { %2756 = vrsqrt.f32 %v1319_v16 }
 0x548   :  { %2758 = vrsqrt.f32 %v1320_v41 }
 0x549   :  { %2760 = vrsqrt.f32 %v1321_v12 }
 0x54a   :  { %2762 = vrsqrt.f32 %v1322_v35 }
 0x54b   :  { %2764 = vrsqrt.f32 %v1323_v18 }
 0x54c   :  { %2766 = vrsqrt.f32 %v1324_v17 }
 0x552   :  { %v2753_v43 = vpop.eup %2752 }
 0x553   :  { %v1275_v49 = vmul.f32 %v2753_v43, %v4263_v56  ;;  %v1274_v8 = vmul.f32 %v2753_v43, %v4259_v47  ;;  %v1273_v4 = vmul.f32 %v2753_v43, %v4253_v57  ;;  %v1272_v26 = vmul.f32 %v2753_v43, %v4249_v44  ;;  %v2755_v30 = vpop.eup %2754 }
 0x554   :  { %v1271_v63 = vmul.f32 %v2753_v43, %v4206_v10  ;;  %v1270_v5 = vmul.f32 %v2753_v43, %v4202_v3  ;;  %v1269_v11 = vmul.f32 %v2753_v43, %v4198_v2  ;;  %v1268_v23 = vmul.f32 %v2753_v43, %v4194_v45  ;;  %v2757_v31 = vpop.eup %2756 }
 0x555   :  { %2569 = vmatprep.subr.mxu1 %v1275_v49  ;;  %v1267_v25 = vmul.f32 %v2753_v43, %v4664_v20  ;;  %v1266_v29 = vmul.f32 %v2753_v43, %v4663_v37  ;;  %v1265_v33 = vmul.f32 %v2753_v43, %v4662_v7  ;;  %v1334_v36 = vmul.f32 %v2755_v30, %v4665_v34  ;;  %v2759_v40 = vpop.eup %2758 }
 0x556   :  { %2570 = vmatpush3.msra.mxu1 %v1275_v49  ;;  %v1264_v39 = vmul.f32 %v2753_v43, %v4661_v24  ;;  %v1335_v53 = vmul.f32 %v2835_v19, %v2757_v31  ;;  %v2761_v54 = vpop.eup %2760  ;;  %v1336_v48 = vmul.f32 %v2836_v50, %v2759_v40 }
 0x557   :  { %2571 = vmatprep.subr.mxu1 %v1274_v8  ;;  %v2763_v46 = vpop.eup %2762  ;;  %v1337_v59 = vmul.f32 %v2761_v54, %v4668_v60 }
 0x558   :  { %2572 = vmatpush3.msra.mxu1 %v1274_v8  ;;  %v2765_v58 = vpop.eup %2764  ;;  %v1338_v55 = vmul.f32 %v2837_v32, %v2763_v46 }
 0x559   :  { %2573 = vmatprep.subr.mxu1 %v1273_v4  ;;  %v2767_v15 = vpop.eup %2766  ;;  %v1339_v51 = vmul.f32 %v2765_v58, %v4671_v22 }
 0x55a   :  { %2574 = vmatpush3.msra.mxu1 %v1273_v4  ;;  %v1340_v9 = vmul.f32 %v2838_v62, %v2767_v15 }
 0x55b   :  { %2575 = vmatprep.subr.mxu1 %v1272_v26 }
 0x55c   :  { %2576 = vmatpush3.msra.mxu1 %v1272_v26 }
 0x55d   :  { %2577 = vmatprep.subr.mxu1 %v1271_v63 }
 0x55e   :  { %2578 = vmatpush3.msra.mxu1 %v1271_v63 }
 0x55f   :  { %2579 = vmatprep.subr.mxu1 %v1270_v5 }
 0x560   :  { %2580 = vmatpush3.msra.mxu1 %v1270_v5 }
 0x561   :  { %2581 = vmatprep.subr.mxu1 %v1269_v11 }
 0x562   :  { %2582 = vmatpush3.msra.mxu1 %v1269_v11 }
 0x563   :  { %2583 = vmatprep.subr.mxu1 %v1268_v23 }
 0x564   :  { %2584 = vmatpush3.msra.mxu1 %v1268_v23 }
 0x565   :  { %2585 = vmatprep.subr.mxu1 %v1267_v25 }
 0x566   :  { %2586 = vmatpush3.msra.mxu1 %v1267_v25 }
 0x567   :  { %2587 = vmatprep.subr.mxu1 %v1266_v29 }
 0x568   :  { %2588 = vmatpush3.msra.mxu1 %v1266_v29 }
 0x569   :  { %2589 = vmatprep.subr.mxu1 %v1265_v33 }
 0x56a   :  { %2590 = vmatpush3.msra.mxu1 %v1265_v33 }
 0x56b   :  { %2591 = vmatprep.subr.mxu1 %v1264_v39 }
 0x56c   :  { %2592 = vmatpush3.msra.mxu1 %v1264_v39 }
 0x56d   :  { %2594 = vmatmul.mubr.msk.f32.vlgmr.msra.gmra.mxu1 %vm4666_vm8, %v1334_v36  ;;  %vm4683_vm8 = vmmov %vm4669_vm0 }
 0x56e   :  { %2596 = vmatprep.mubr.msk.f32.mxu1 %vm4667_vm6, %v1335_v53  ;;  %vm4684_vm6 = vmmov %vm4669_vm0 }
 0x571   :  { %2597 = vmatmul.mubr.msk.f32.gmra.mxu1 %vm4669_vm0, %v1336_v48 }
 0x572   :  { %2599 = vmatprep.mubr.msk.f32.mxu1 %vm4670_vm10, %v1337_v59  ;;  %vm4685_vm10 = vmmov %vm4669_vm0 }
 0x575   :  { %2600 = vmatmul.mubr.msk.f32.gmra.mxu1 %vm4672_vm11, %v1338_v55 }
 0x576   :  { %2602 = vmatprep.mubr.msk.f32.mxu1 %vm4673_vm12, %v1339_v51 }
 0x579   :  { %2603 = vmatmul.mubr.msk.f32.gmra.mxu1 %vm4674_vm13, %v1340_v9 }
 0x57a   :  { %2621 = vmatprep.mubr.msk.f32.mxu1 %vm1541_vm7, %v1529_v13 }
 0x62d   :  { %v2595_v61 = vpop.f32.mrf.mxu1 }
 0x62f   :  { %v1431_v21 = vpop.f32.mrf.mxu1 }
 0x631   :  { %v2598_v52 = vpop.f32.mrf.mxu1 }
 0x633   :  { %v1441_v42 = vpop.f32.mrf.mxu1 }
 0x635   :  { %v2601_v6 = vpop.f32.mrf.mxu1 }
 0x636   :  { %v1471_v8 = vmax.f32 %v2595_v61, %v2601_v6 }
 0x637   :  { %v1451_v43 = vpop.f32.mrf.mxu1 }
 0x638   :  { %v1470_v1 = vmax.f32 %v1431_v21, %v1451_v43 }
 0x639   :  { %v2604_v49 = vpop.f32.mrf.mxu1 }
 0x63a   :  { %v1473_v16 = vmax.f32 %v2598_v52, %v2604_v49  ;;  %v1474_v4 = vmax.f32 %v1470_v1, %v1471_v8 }
 0x63b   :  { %v1461_v14 = vpop.f32.mrf.mxu1 }
 0x63c   :  { %v1472_v0 = vmax.f32 %v1441_v42, %v1461_v14 }
 0x63e   :  { %v1475_v41 = vmax.f32 %v1472_v0, %v1473_v16 }
 0x640   :  { %v1476_v26 = vmax.f32 %v1474_v4, %v1475_v41 }
 0x642   :  { %v1477_v28 = vrot.slane %v1476_v26, 4 }
 0x644   :  { %v1478_v12 = vmax.f32 %v1476_v26, %v1477_v28  ;;  %v1530_v28 = vld [vmem:[%s4515_s7 + $0x8] sm:$0xff] }
 0x646   :  { %v1479_v63 = vrot.slane %v1478_v12, 2 }
 0x648   :  { %v1480_v35 = vmax.f32 %v1478_v12, %v1479_v63  ;;  %v1531_v12 = vld [vmem:[%s4515_s7 + $0x10] sm:$0xff]  ;;  %v1532_v63 = vld [vmem:[%s4515_s7 + $0x18] sm:$0xff] }
 0x64a   :  { %v1481_v38 = vrot.slane %v1480_v35, 1 }
 0x64c   :  { %v1482_v5 = vmax.f32 %v1480_v35, %v1481_v38  ;;  %v1533_v35 = vld [vmem:[%s4515_s7 + $0x20] sm:$0xff]  ;;  %v1534_v38 = vld [vmem:[%s4515_s7 + $0x28] sm:$0xff] }
 0x64e   :  { %v1483_v18 = vsub.f32 %v1431_v21, %v1482_v5  ;;  %v1484_v11 = vsub.f32 %v2595_v61, %v1482_v5  ;;  %v1485_v27 = vsub.f32 %v1441_v42, %v1482_v5  ;;  %v1486_v17 = vsub.f32 %v2598_v52, %v1482_v5 }
 0x64f   :  { %v1487_v29 = vsub.f32 %v1451_v43, %v1482_v5  ;;  %v1488_v31 = vsub.f32 %v2601_v6, %v1482_v5  ;;  %v1489_v34 = vsub.f32 %v1461_v14, %v1482_v5  ;;  %v1490_v40 = vsub.f32 %v2604_v49, %v1482_v5  ;;  %v1535_v5 = vld [vmem:[%s4515_s7 + $0x30] sm:$0xff] }
 0x650   :  { %v1491_v23 = vmul.f32 1.442695, %v1483_v18  ;;  %v1493_v25 = vmul.f32 1.442695, %v1484_v11  ;;  %v1495_v30 = vmul.f32 1.442695, %v1485_v27 }
 0x651   :  { %v1497_v33 = vmul.f32 1.442695, %v1486_v17  ;;  %v1499_v36 = vmul.f32 1.442695, %v1487_v29  ;;  %v1501_v39 = vmul.f32 1.442695, %v1488_v31 }
 0x652   :  { %2768 = vpow2.f32 %v1491_v23  ;;  %v1503_v19 = vmul.f32 1.442695, %v1489_v34  ;;  %v1505_v53 = vmul.f32 1.442695, %v1490_v40  ;;  %v1536_v18 = vld [vmem:[%s4515_s7 + $0x38] sm:$0xff]  ;;  %v1537_v11 = vld [vmem:[%s4515_s7 + $0x40] sm:$0xff] }
 0x653   :  { %2770 = vpow2.f32 %v1493_v25  ;;  %v1538_v27 = vld [vmem:[%s4515_s7 + $0x48] sm:$0xff]  ;;  %v1539_v17 = vld [vmem:[%s4515_s7 + $0x50] sm:$0xff]  ;;  %v1540_v23 = vld [vmem:[%s4515_s7 + $0x58] sm:$0xff] }
 0x654   :  { %2772 = vpow2.f32 %v1495_v30  ;;  %v1715_v25 = vld [vmem:[%s4516_s8] sm:$0xff] }
 0x655   :  { %2774 = vpow2.f32 %v1497_v33  ;;  %v1723_v29 = vld [vmem:[%s4516_s8 + $0x40] sm:$0xff]  ;;  %2663 = vmatprep.mubr.msk.f32.mxu0 %vm4675_vm9, %v1715_v25 }
 0x656   :  { %2776 = vpow2.f32 %v1499_v36 }
 0x657   :  { %2778 = vpow2.f32 %v1501_v39 }
 0x658   :  { %2780 = vpow2.f32 %v1503_v19 }
 0x659   :  { %2782 = vpow2.f32 %v1505_v53 }
 0x65f   :  { %v2769_v54 = vpop.eup %2768 }
 0x660   :  { %v2771_v50 = vpop.eup %2770 }
 0x661   :  { %v1507_v48 = vadd.f32 %v2771_v50, %v2769_v54  ;;  %v2773_v46 = vpop.eup %2772 }
 0x662   :  { %v2775_v59 = vpop.eup %2774 }
 0x663   :  { %v1508_v60 = vadd.f32 %v2773_v46, %v1507_v48  ;;  %v2777_v32 = vpop.eup %2776 }
 0x664   :  { %v2779_v15 = vpop.eup %2778 }
 0x665   :  { %v1509_v58 = vadd.f32 %v2775_v59, %v1508_v60  ;;  %v2781_v51 = vpop.eup %2780 }
 0x666   :  { %v2783_v9 = vpop.eup %2782 }
 0x667   :  { %v1510_v55 = vadd.f32 %v2777_v32, %v1509_v58 }
 0x669   :  { %v1511_v22 = vadd.f32 %v2779_v15, %v1510_v55 }
 0x66b   :  { %v1512_v62 = vadd.f32 %v2781_v51, %v1511_v22 }
 0x66d   :  { %v1513_v13 = vadd.f32 %v2783_v9, %v1512_v62 }
 0x66f   :  { %v1514_v61 = vrot.slane %v1513_v13, 4 }
 0x671   :  { %v1515_v21 = vadd.f32 %v1514_v61, %v1513_v13  ;;  %v1716_v61 = vld [vmem:[%s4516_s8 + $0x8] sm:$0xff] }
 0x673   :  { %v1516_v52 = vrot.slane %v1515_v21, 2 }
 0x675   :  { %v1517_v42 = vadd.f32 %v1516_v52, %v1515_v21  ;;  %v1724_v21 = vld [vmem:[%s4516_s8 + $0x48] sm:$0xff]  ;;  %v1717_v52 = vld [vmem:[%s4516_s8 + $0x10] sm:$0xff] }
 0x677   :  { %v1518_v6 = vrot.slane %v1517_v42, 1 }
 0x679   :  { %v1519_v43 = vadd.f32 %v1518_v6, %v1517_v42  ;;  %v1725_v42 = vld [vmem:[%s4516_s8 + $0x50] sm:$0xff]  ;;  %v1718_v6 = vld [vmem:[%s4516_s8 + $0x18] sm:$0xff] }
 0x67b   :  { %2784 = vrcp.f32 %v1519_v43  ;;  %v1726_v43 = vld [vmem:[%s4516_s8 + $0x58] sm:$0xff] }
 0x688   :  { %v2785_v49 = vpop.eup %2784 }
 0x689   :  { %v1528_v1 = vmul.f32 %v2785_v49, %v2783_v9  ;;  %v1527_v14 = vmul.f32 %v2785_v49, %v2781_v51  ;;  %v1526_v8 = vmul.f32 %v2785_v49, %v2779_v15  ;;  %v1525_v16 = vmul.f32 %v2785_v49, %v2777_v32 }
 0x68a   :  { %v1524_v0 = vmul.f32 %v2785_v49, %v2775_v59  ;;  %v1523_v4 = vmul.f32 %v2785_v49, %v2773_v46  ;;  %v1522_v41 = vmul.f32 %v2785_v49, %v2771_v50  ;;  %v1521_v26 = vmul.f32 %v2785_v49, %v2769_v54  ;;  %v1719_v49 = vld [vmem:[%s4516_s8 + $0x20] sm:$0xff] }
 0x68b   :  { %2605 = vmatprep.subr.mxu1 %v1528_v1 }
 0x68c   :  { %2606 = vmatpush3.msra.mxu1 %v1528_v1  ;;  %v1720_v1 = vld [vmem:[%s4516_s8 + $0x28] sm:$0xff] }
 0x68d   :  { %2607 = vmatprep.subr.mxu1 %v1527_v14 }
 0x68e   :  { %2608 = vmatpush3.msra.mxu1 %v1527_v14  ;;  %v1721_v14 = vld [vmem:[%s4516_s8 + $0x30] sm:$0xff] }
 0x68f   :  { %2609 = vmatprep.subr.mxu1 %v1526_v8 }
 0x690   :  { %2610 = vmatpush3.msra.mxu1 %v1526_v8  ;;  %v1722_v8 = vld [vmem:[%s4516_s8 + $0x38] sm:$0xff]  ;;  %s2889_s8 = smov [#allocation6]  }
 0x691   :  { %2611 = vmatprep.subr.mxu1 %v1525_v16  ;;  %s2097_s27 = sshll.u32 %s2889_s8, 4  ;;  %s2098_s27 = int_to_ptr.vmem [resolvable:$true] %s2097_s27 }
 0x692   :  { %2612 = vmatpush3.msra.mxu1 %v1525_v16  ;;  %v1742_v16 = vpop.permute.xlu1 %1741  ;;  %s2859_s28 = scalar_lea.vmem %s2098_s27, 1536  ;;  %p2864_p6 = scmp.lt.s32.totalorder %s2098_s27, %s2098_s27 }
 0x693   :  { %2613 = vmatprep.subr.mxu1 %v1524_v0  ;;  %p2860_p5 = scmp.ne.s32.totalorder %s2098_s27, %s2859_s28  ;;  %p2865_p7 = scmp.lt.s32.totalorder %s2859_s28, %s2859_s28 }
 0x694   :  { %2614 = vmatpush3.msra.mxu1 %v1524_v0 }
 0x695   :  { %2615 = vmatprep.subr.mxu1 %v1523_v4  ;;  %p2866_p8 = por %p2865_p7, %p2864_p6 }
 0x696   :  { %2616 = vmatpush3.msra.mxu1 %v1523_v4  ;;  %v1752_v0 = vpop.permute.xlu1 %1751  ;;  %v1747_v4 = vpop.permute.xlu0 %1746 }
 0x697   :  { %2617 = vmatprep.subr.mxu1 %v1522_v41  ;;  %p2867_p9 = pnand %p2866_p8, %p2860_p5 }
 0x698   :  { %2618 = vmatpush3.msra.mxu1 %v1522_v41 }
 0x699   :  { %2619 = vmatprep.subr.mxu1 %v1521_v26 }
 0x69a   :  { %2620 = vmatpush3.msra.mxu1 %v1521_v26  ;;  %v1757_v41 = vpop.permute.xlu1 %1756  ;;  %v1762_v26 = vpop.permute.xlu0 %1761 }
 0x69b   :  { %2622 = vmatmul.mubr.msk.f32.vlgmr.msra.gmra.mxu1 %vm1541_vm7, %v1530_v28 }
 0x69c   :  { %2624 = vmatprep.mubr.msk.f32.mxu1 %vm1541_vm7, %v1531_v12 }
 0x69e   :  { %v1767_v28 = vpop.permute.xlu1 %1766  ;;  %v1772_v12 = vpop.permute.xlu0 %1771 }
 0x69f   :  { %2625 = vmatmul.mubr.msk.f32.gmra.mxu1 %vm1541_vm7, %v1532_v63 }
 0x6a0   :  { %2627 = vmatprep.mubr.msk.f32.mxu1 %vm1541_vm7, %v1533_v35 }
 0x6a2   :  { %v1777_v63 = vpop.permute.xlu1 %1776  ;;  %v1782_v35 = vpop.permute.xlu0 %1781 }
 0x6a3   :  { %2628 = vmatmul.mubr.msk.f32.gmra.mxu1 %vm1541_vm7, %v1534_v38 }
 0x6a4   :  { %2630 = vmatprep.mubr.msk.f32.mxu1 %vm1541_vm7, %v1535_v5 }
 0x6a6   :  { %v1787_v38 = vpop.permute.xlu1 %1786 }
 0x6a7   :  { %2631 = vmatmul.mubr.msk.f32.gmra.mxu1 %vm1541_vm7, %v1536_v18 }
 0x6a8   :  { %2633 = vmatprep.mubr.msk.f32.mxu1 %vm1541_vm7, %v1537_v11 }
 0x6ab   :  { %2634 = vmatmul.mubr.msk.f32.gmra.mxu1 %vm1541_vm7, %v1538_v27 }
 0x6ac   :  { %2636 = vmatprep.mubr.msk.f32.mxu1 %vm1541_vm7, %v1539_v17 }
 0x6af   :  { %2637 = vmatmul.mubr.msk.f32.gmra.mxu1 %vm1541_vm7, %v1540_v23 }
 0x6b0   :  { %2675 = vmatprep.mubr.msk.f32.mxu1 %vm4676_vm1, %v1723_v29 }
 0x75b   :  { %v2623_v30 = vpop.f32.mrf.mxu1 }
 0x75c   :  { %v4424_v9 = vsub.f32 %v4662_v7, %v2623_v30 }
 0x75d   :  { %v1644_v31 = vpop.f32.mrf.mxu1 }
 0x75e   :  { %v4431_v13 = vsub.f32 %v4661_v24, %v1644_v31 }
 0x75f   :  { %v2626_v33 = vpop.f32.mrf.mxu1 }
 0x760   :  { %v4410_v51 = vsub.f32 %v4664_v20, %v2626_v33 }
 0x761   :  { %v1654_v34 = vpop.f32.mrf.mxu1 }
 0x762   :  { %v4417_v62 = vsub.f32 %v4663_v37, %v1654_v34 }
 0x763   :  { %v2629_v36 = vpop.f32.mrf.mxu1 }
 0x764   :  { %v4396_v15 = vsub.f32 %v4198_v2, %v2629_v36  ;;  %v1792_v36 = vpop.permute.xlu0 %1791 }
 0x765   :  { %v1664_v39 = vpop.f32.mrf.mxu1 }
 0x766   :  { %v4403_v22 = vsub.f32 %v4194_v45, %v1664_v39  ;;  %v1797_v39 = vpop.permute.xlu1 %1796 }
 0x767   :  { %v2632_v40 = vpop.f32.mrf.mxu1 }
 0x768   :  { %v4382_v32 = vsub.f32 %v4206_v10, %v2632_v40 }
 0x769   :  { %v1674_v19 = vpop.f32.mrf.mxu1 }
 0x76a   :  { %v4389_v55 = vsub.f32 %v4202_v3, %v1674_v19 }
 0x76b   :  { %v2635_v53 = vpop.f32.mrf.mxu1 }
 0x76c   :  { %v4368_v59 = vsub.f32 %v4253_v57, %v2635_v53 }
 0x76d   :  { %v1684_v54 = vpop.f32.mrf.mxu1 }
 0x76e   :  { %v4375_v58 = vsub.f32 %v4249_v44, %v1684_v54 }
 0x76f   :  { %v2638_v50 = vpop.f32.mrf.mxu1 }
 0x770   :  { %v4358_v48 = vsub.f32 %v4263_v56, %v2638_v50 }
 0x771   :  { %v1694_v46 = vpop.f32.mrf.mxu1 }
 0x772   :  { %v4361_v60 = vsub.f32 %v4259_v47, %v1694_v46  ;;  %2639 = vmatprep.subr.mxu0 %v4358_v48  ;;  %2681 = vmatprep.subr.mxu1 %v4358_v48 }
 0x773   :  { %2640 = vmatpush3.msra.mxu0 %v4358_v48  ;;  %2693 = vmatpush3.msra.mxu1 %v4358_v48 }
 0x774   :  { %2641 = vmatprep.subr.mxu0 %v4361_v60  ;;  %2682 = vmatprep.subr.mxu1 %v4361_v60 }
 0x775   :  { %2642 = vmatpush3.msra.mxu0 %v4361_v60  ;;  %2694 = vmatpush3.msra.mxu1 %v4361_v60 }
 0x776   :  { %2643 = vmatprep.subr.mxu0 %v4368_v59  ;;  %2683 = vmatprep.subr.mxu1 %v4368_v59 }
 0x777   :  { %2644 = vmatpush3.msra.mxu0 %v4368_v59  ;;  %2695 = vmatpush3.msra.mxu1 %v4368_v59 }
 0x778   :  { %2645 = vmatprep.subr.mxu0 %v4375_v58  ;;  %2684 = vmatprep.subr.mxu1 %v4375_v58 }
 0x779   :  { %2646 = vmatpush3.msra.mxu0 %v4375_v58  ;;  %2696 = vmatpush3.msra.mxu1 %v4375_v58 }
 0x77a   :  { %2647 = vmatprep.subr.mxu0 %v4382_v32  ;;  %2685 = vmatprep.subr.mxu1 %v4382_v32 }
 0x77b   :  { %2648 = vmatpush3.msra.mxu0 %v4382_v32  ;;  %2697 = vmatpush3.msra.mxu1 %v4382_v32 }
 0x77c   :  { %2649 = vmatprep.subr.mxu0 %v4389_v55  ;;  %2686 = vmatprep.subr.mxu1 %v4389_v55 }
 0x77d   :  { %2650 = vmatpush3.msra.mxu0 %v4389_v55  ;;  %2698 = vmatpush3.msra.mxu1 %v4389_v55 }
 0x77e   :  { %2651 = vmatprep.subr.mxu0 %v4396_v15  ;;  %2687 = vmatprep.subr.mxu1 %v4396_v15 }
 0x77f   :  { %2652 = vmatpush3.msra.mxu0 %v4396_v15  ;;  %2699 = vmatpush3.msra.mxu1 %v4396_v15 }
 0x780   :  { %2653 = vmatprep.subr.mxu0 %v4403_v22  ;;  %2688 = vmatprep.subr.mxu1 %v4403_v22 }
 0x781   :  { %2654 = vmatpush3.msra.mxu0 %v4403_v22  ;;  %2700 = vmatpush3.msra.mxu1 %v4403_v22 }
 0x782   :  { %2655 = vmatprep.subr.mxu0 %v4410_v51  ;;  %2689 = vmatprep.subr.mxu1 %v4410_v51 }
 0x783   :  { %2656 = vmatpush3.msra.mxu0 %v4410_v51  ;;  %2701 = vmatpush3.msra.mxu1 %v4410_v51 }
 0x784   :  { %2657 = vmatprep.subr.mxu0 %v4417_v62  ;;  %2690 = vmatprep.subr.mxu1 %v4417_v62 }
 0x785   :  { %2658 = vmatpush3.msra.mxu0 %v4417_v62  ;;  %2702 = vmatpush3.msra.mxu1 %v4417_v62 }
 0x786   :  { %2659 = vmatprep.subr.mxu0 %v4424_v9  ;;  %2691 = vmatprep.subr.mxu1 %v4424_v9 }
 0x787   :  { %2660 = vmatpush3.msra.mxu0 %v4424_v9  ;;  %2703 = vmatpush3.msra.mxu1 %v4424_v9 }
 0x788   :  { %2661 = vmatprep.subr.mxu0 %v4431_v13  ;;  %2692 = vmatprep.subr.mxu1 %v4431_v13 }
 0x789   :  { %2662 = vmatpush3.msra.mxu0 %v4431_v13  ;;  %2704 = vmatpush3.msra.mxu1 %v4431_v13 }
 0x78a   :  { %2664 = vmatmul.mubr.msk.f32.vlgmr.msra.gmra.mxu0 %vm4677_vm2, %v1716_v61  ;;  %2676 = vmatmul.mubr.msk.f32.vlgmr.msra.gmra.mxu1 %vm4678_vm4, %v1724_v21 }
 0x78b   :  { %2666 = vmatprep.mubr.msk.f32.mxu0 %vm4679_vm3, %v1717_v52  ;;  %2678 = vmatprep.mubr.msk.f32.mxu1 %vm4680_vm14, %v1725_v42 }
 0x78e   :  { %2667 = vmatmul.mubr.msk.f32.gmra.mxu0 %vm4681_vm15, %v1718_v6  ;;  %2679 = vmatmul.mubr.msk.f32.gmra.mxu1 %vm4682_vm5, %v1726_v43 }
 0x78f   :  { %2669 = vmatprep.mubr.msk.f32.mxu0 %vm4683_vm8, %v1719_v49 }
 0x792   :  { %2670 = vmatmul.mubr.msk.f32.gmra.mxu0 %vm4684_vm6, %v1720_v1 }
 0x793   :  { %2672 = vmatprep.mubr.msk.f32.mxu0 %vm4669_vm0, %v1721_v14 }
 0x796   :  { %2673 = vmatmul.mubr.msk.f32.gmra.mxu0 %vm4685_vm10, %v1722_v8 }
 0x84a   :  { %v2665_v5 = vpop.f32.mrf.mxu0  ;;  %v2677_v18 = vpop.f32.mrf.mxu1 }
 0x84b   :  { %v1907_v11 = vadd.f32 %v2665_v5, %v1747_v4  ;;  %v1947_v27 = vadd.f32 %v2677_v18, %v1787_v38 }
 0x84c   :  { %v1901_v17 = vpop.f32.mrf.mxu0  ;;  %v1941_v23 = vpop.f32.mrf.mxu1 }
 0x84d   :  { %v2371_v25 = vmul.f32 -1.442695, %v1907_v11  ;;  %v2379_v29 = vmul.f32 -1.442695, %v1947_v27  ;;  %v1902_v30 = vadd.f32 %v1901_v17, %v1742_v16  ;;  %v1942_v31 = vadd.f32 %v1941_v23, %v1782_v35 }
 0x84e   :  { %v2668_v33 = vpop.f32.mrf.mxu0  ;;  %v2680_v34 = vpop.f32.mrf.mxu1 }
 0x84f   :  { %2786 = vpow2.f32 %v2371_v25  ;;  %v2370_v40 = vmul.f32 -1.442695, %v1902_v30  ;;  %v2378_v19 = vmul.f32 -1.442695, %v1942_v31  ;;  %v1917_v53 = vadd.f32 %v2668_v33, %v1757_v41 }
 0x850   :  { %2788 = vpow2.f32 %v2379_v29  ;;  %v1957_v54 = vadd.f32 %v2680_v34, %v1797_v39  ;;  %v1911_v50 = vpop.f32.mrf.mxu0  ;;  %v1951_v46 = vpop.f32.mrf.mxu1 }
 0x851   :  { %2790 = vpow2.f32 %v2370_v40  ;;  %v2373_v61 = vmul.f32 -1.442695, %v1917_v53  ;;  %v1912_v21 = vadd.f32 %v1911_v50, %v1752_v0  ;;  %v1952_v52 = vadd.f32 %v1951_v46, %v1792_v36 }
 0x852   :  { %2792 = vpow2.f32 %v2378_v19  ;;  %v2381_v42 = vmul.f32 -1.442695, %v1957_v54  ;;  %v2671_v6 = vpop.f32.mrf.mxu0 }
 0x853   :  { %2794 = vpow2.f32 %v2373_v61  ;;  %v2372_v43 = vmul.f32 -1.442695, %v1912_v21  ;;  %v2380_v49 = vmul.f32 -1.442695, %v1952_v52  ;;  %v1927_v1 = vadd.f32 %v2671_v6, %v1767_v28 }
 0x854   :  { %2796 = vpow2.f32 %v2381_v42  ;;  %v1921_v14 = vpop.f32.mrf.mxu0 }
 0x855   :  { %2798 = vpow2.f32 %v2372_v43  ;;  %v2375_v8 = vmul.f32 -1.442695, %v1927_v1  ;;  %v1922_v16 = vadd.f32 %v1921_v14, %v1762_v26 }
 0x856   :  { %2800 = vpow2.f32 %v2380_v49  ;;  %v2674_v4 = vpop.f32.mrf.mxu0 }
 0x857   :  { %2802 = vpow2.f32 %v2375_v8  ;;  %v2374_v41 = vmul.f32 -1.442695, %v1922_v16  ;;  %v1937_v35 = vadd.f32 %v2674_v4, %v1777_v63 }
 0x858   :  { %v1931_v38 = vpop.f32.mrf.mxu0 }
 0x859   :  { %2804 = vpow2.f32 %v2374_v41  ;;  %v2377_v0 = vmul.f32 -1.442695, %v1937_v35  ;;  %v1932_v5 = vadd.f32 %v1931_v38, %v1772_v12 }
 0x85b   :  { %2806 = vpow2.f32 %v2377_v0  ;;  %v2376_v18 = vmul.f32 -1.442695, %v1932_v5 }
 0x85c   :  { %v2787_v11 = vpop.eup %2786 }
 0x85d   :  { %v2789_v27 = vpop.eup %2788  ;;  %v1997_v17 = vadd.f32 1.0, %v2787_v11  ;;  %2808 = vpow2.f32 %v2376_v18 }
 0x85e   :  { %v2791_v28 = vpop.eup %2790  ;;  %v2005_v23 = vadd.f32 1.0, %v2789_v27 }
 0x85f   :  { %v2793_v25 = vpop.eup %2792  ;;  %2810 = vrcp.f32 %v1997_v17  ;;  %v1996_v26 = vadd.f32 1.0, %v2791_v28 }
 0x860   :  { %v2795_v29 = vpop.eup %2794  ;;  %2812 = vrcp.f32 %v2005_v23  ;;  %v2004_v30 = vadd.f32 1.0, %v2793_v25 }
 0x861   :  { %v2797_v31 = vpop.eup %2796  ;;  %2814 = vrcp.f32 %v1996_v26  ;;  %v1999_v63 = vadd.f32 1.0, %v2795_v29 }
 0x862   :  { %v2799_v33 = vpop.eup %2798  ;;  %2816 = vrcp.f32 %v2004_v30  ;;  %v2007_v12 = vadd.f32 1.0, %v2797_v31 }
 0x863   :  { %v2801_v34 = vpop.eup %2800  ;;  %2818 = vrcp.f32 %v1999_v63  ;;  %v1998_v36 = vadd.f32 1.0, %v2799_v33 }
 0x864   :  { %v2803_v39 = vpop.eup %2802  ;;  %2820 = vrcp.f32 %v2007_v12  ;;  %v2006_v40 = vadd.f32 1.0, %v2801_v34 }
 0x865   :  { %2822 = vrcp.f32 %v1998_v36  ;;  %v2001_v19 = vadd.f32 1.0, %v2803_v39 }
 0x866   :  { %v2805_v53 = vpop.eup %2804  ;;  %2824 = vrcp.f32 %v2006_v40 }
 0x867   :  { %2826 = vrcp.f32 %v2001_v19  ;;  %v2000_v54 = vadd.f32 1.0, %v2805_v53 }
 0x868   :  { %v2807_v50 = vpop.eup %2806 }
 0x869   :  { %2828 = vrcp.f32 %v2000_v54  ;;  %v2003_v46 = vadd.f32 1.0, %v2807_v50 }
 0x86a   :  { %v2809_v61 = vpop.eup %2808 }
 0x86b   :  { %2830 = vrcp.f32 %v2003_v46  ;;  %v2002_v21 = vadd.f32 1.0, %v2809_v61 }
 0x86c   :  { %v2811_v52 = vpop.eup %2810 }
 0x86d   :  { %v2813_v42 = vpop.eup %2812  ;;  %v2045_v6 = vsub.f32 1.0, %v2811_v52  ;;  %2832 = vrcp.f32 %v2002_v21  ;;  %v2033_v14 = vmul.f32 %v2811_v52, %v4662_v7 }
 0x86e   :  { %v2815_v43 = vpop.eup %2814  ;;  %v2053_v49 = vsub.f32 1.0, %v2813_v42  ;;  %v2041_v41 = vmul.f32 %v2813_v42, %v4253_v57 }
 0x86f   :  { %v2817_v1 = vpop.eup %2816  ;;  %v2057_v8 = vmul.f32 %v2045_v6, %v4424_v9  ;;  %v2044_v16 = vsub.f32 1.0, %v2815_v43  ;;  %v2032_v18 = vmul.f32 %v2815_v43, %v4661_v24 }
 0x870   :  { %v2819_v4 = vpop.eup %2818  ;;  %v2065_v35 = vmul.f32 %v2053_v49, %v4368_v59  ;;  %v2052_v38 = vsub.f32 1.0, %v2817_v1  ;;  %v2040_v7 = vmul.f32 %v2817_v1, %v4249_v44 }
 0x871   :  { %v2821_v0 = vpop.eup %2820  ;;  %v2069_v5 = vadd.f32 %v2057_v8, %v2033_v14  ;;  %v2056_v11 = vmul.f32 %v2044_v16, %v4431_v13  ;;  %v2047_v27 = vsub.f32 1.0, %v2819_v4  ;;  %v2035_v59 = vmul.f32 %v2819_v4, %v4664_v20 }
 0x872   :  { %v2823_v17 = vpop.eup %2822  ;;  %v2077_v28 = vadd.f32 %v2065_v35, %v2041_v41  ;;  %v2064_v9 = vmul.f32 %v2052_v38, %v4375_v58  ;;  %v2055_v23 = vsub.f32 1.0, %v2821_v0  ;;  %v2043_v13 = vmul.f32 %v2821_v0, %v4263_v56 }
 0x873   :  { %v2825_v25 = vpop.eup %2824  ;;  %2081 = vst [vmem:[#allocation6 + $0x8] sm:$0xff] %v2069_v5  ;;  %v2068_v57 = vadd.f32 %v2056_v11, %v2032_v18  ;;  %v2059_v26 = vmul.f32 %v2047_v27, %v4410_v51  ;;  %v2046_v29 = vsub.f32 1.0, %v2823_v17  ;;  %v2034_v58 = vmul.f32 %v2823_v17, %v4663_v37 }
 0x874   :  { %v2827_v30 = vpop.eup %2826  ;;  %2089 = vst [vmem:[#allocation6 + $0x48] sm:$0xff] %v2077_v28  ;;  %v2076_v24 = vadd.f32 %v2064_v9, %v2040_v7  ;;  %v2067_v31 = vmul.f32 %v2055_v23, %v4358_v48  ;;  %v2054_v63 = vsub.f32 1.0, %v2825_v25  ;;  %v2042_v51 = vmul.f32 %v2825_v25, %v4259_v47 }
 0x875   :  { %2080 = vst [vmem:[#allocation6] sm:$0xff] %v2068_v57  ;;  %v2071_v44 = vadd.f32 %v2059_v26, %v2035_v59  ;;  %v2058_v33 = vmul.f32 %v2046_v29, %v4417_v62  ;;  %v2049_v12 = vsub.f32 1.0, %v2827_v30  ;;  %v2037_v56 = vmul.f32 %v2827_v30, %v4198_v2 }
 0x876   :  { %v2829_v34 = vpop.eup %2828  ;;  %2088 = vst [vmem:[#allocation6 + $0x40] sm:$0xff] %v2076_v24  ;;  %v2079_v20 = vadd.f32 %v2067_v31, %v2043_v13  ;;  %v2066_v36 = vmul.f32 %v2054_v63, %v4361_v60 }
 0x877   :  { %2083 = vst [vmem:[#allocation6 + $0x18] sm:$0xff] %v2071_v44  ;;  %v2070_v39 = vadd.f32 %v2058_v33, %v2034_v58  ;;  %v2061_v48 = vmul.f32 %v2049_v12, %v4396_v15  ;;  %v2048_v40 = vsub.f32 1.0, %v2829_v34  ;;  %v2036_v53 = vmul.f32 %v2829_v34, %v4194_v45 }
 0x878   :  { %v2831_v19 = vpop.eup %2830  ;;  %2091 = vst [vmem:[#allocation6 + $0x58] sm:$0xff] %v2079_v20  ;;  %v2078_v37 = vadd.f32 %v2066_v36, %v2042_v51 }
 0x879   :  { %2082 = vst [vmem:[#allocation6 + $0x10] sm:$0xff] %v2070_v39  ;;  %v2073_v62 = vadd.f32 %v2061_v48, %v2037_v56  ;;  %v2060_v54 = vmul.f32 %v2048_v40, %v4403_v22  ;;  %v2051_v50 = vsub.f32 1.0, %v2831_v19  ;;  %v2039_v46 = vmul.f32 %v2831_v19, %v4206_v10 }
 0x87a   :  { %v2833_v47 = vpop.eup %2832  ;;  %2090 = vst [vmem:[#allocation6 + $0x50] sm:$0xff] %v2078_v37 }
 0x87b   :  { %2085 = vst [vmem:[#allocation6 + $0x28] sm:$0xff] %v2073_v62  ;;  %v2072_v60 = vadd.f32 %v2060_v54, %v2036_v53  ;;  %v2063_v2 = vmul.f32 %v2051_v50, %v4382_v32  ;;  %v2050_v15 = vsub.f32 1.0, %v2833_v47  ;;  %v2038_v21 = vmul.f32 %v2833_v47, %v4202_v3 }
 0x87d   :  { %2084 = vst [vmem:[#allocation6 + $0x20] sm:$0xff] %v2072_v60  ;;  %v2075_v61 = vadd.f32 %v2063_v2, %v2039_v46  ;;  %v2062_v45 = vmul.f32 %v2050_v15, %v4389_v55 }
 0x87f   :  { %2087 = vst [vmem:[#allocation6 + $0x38] sm:$0xff] %v2075_v61  ;;  %v2074_v22 = vadd.f32 %v2062_v45, %v2038_v21 }
 0x881   :  { %2086 = vst [vmem:[#allocation6 + $0x30] sm:$0xff] %v2074_v22 }
 0x882   :  { %2870 = shalt.err (!%p2867_p9)
}
 0x883   :  { %s2890_s29 = smov 128   ;;  %s2891_s30 = smov 8  }
 0x884   :  { %2103 = dma.vmem_to_hbm [thread:$0]  %s2098_s27, 1536, %s4518_s10, [#allocation5], %s2890_s29, %s2890_s29, %s2891_s30  }
 0x885   :  { %2881 = dma.done.wait [#allocation5], 1536  }
 0x886   :  { %2882 = vsyncadd [#allocation5], 4294965760 }
 0x887   :  { %2107 = vsyncpa [#allocation4], 1 }
 0x888   :  { %2108 = vsyncpa [#allocation5], 1 }

</bundles_post_ra>
